<compile_context>
chip_gen: v7x
topology: tpu7x:2x2x1
jax: 0.10.0
libtpu: 0.0.40
codegen_flags: <defaults>
</compile_context>

<pallas_src>
import math

import jax
import jax.numpy as jnp
from jax import lax
from jax.experimental import pallas as pl
from jax.experimental.pallas import tpu as pltpu

NEGATIVE_SLOPE = 0.2
MASK_VALUE = -1e30
_PREC = lax.Precision.HIGHEST  # full-f32 MXU passes so kernel & reference agree tightly


def _round_up(x, m):
    return ((x + m - 1) // m) * m


# --------------------------------------------------------------------------------------
# Kernel 1: h = A @ (feat @ W^T)  (computed as (A @ feat) @ W^T, tiled over A)
# --------------------------------------------------------------------------------------
def aggregate_kernel(a_ref, x_ref, wt_ref, h_ref, acc_ref):
    k = pl.program_id(1)

    @pl.when(k == 0)
    def _init():
        acc_ref[...] = jnp.zeros_like(acc_ref)

    # A tile arrives as bf16 (exact 0/1); accumulate (A @ feat) in f32.
    acc_ref[...] += jnp.dot(
        a_ref[...].astype(jnp.float32), x_ref[...],
        preferred_element_type=jnp.float32, precision=_PREC)

    @pl.when(k == pl.num_programs(1) - 1)
    def _finalize():
        # (A @ feat) @ W^T == A @ (feat @ W^T); W^T is padded to a lane-dense 128 cols.
        h_ref[...] = jnp.dot(
            acc_ref[...], wt_ref[...],
            preferred_element_type=jnp.float32, precision=_PREC)


# --------------------------------------------------------------------------------------
# Kernel 2: edge scores + per-destination edge softmax, one dst row strip per grid step.
# --------------------------------------------------------------------------------------
def score_softmax_kernel(a_ref, hd_ref, hall_ref, esoft_ref):
    # s[v, u] = <tanh(h[v]), h[u]> : contract the feature dim of BOTH operands
    # (NT matmul -> no explicit transpose / XLU relayout of h).
    s = lax.dot_general(
        jnp.tanh(hd_ref[...]), hall_ref[...],
        dimension_numbers=(((1,), (1,)), ((), ())),
        preferred_element_type=jnp.float32, precision=_PREC)      # (TM, N_pad)

    # LeakyReLU(0.2) folded into a single max (slope < 1).
    e = jnp.maximum(s, NEGATIVE_SLOPE * s)

    # Mask non-edges with a large finite negative (no isfinite fixup pass needed).
    masked = jnp.where(a_ref[...] > 0, e, MASK_VALUE)

    m = jnp.max(masked, axis=1, keepdims=True)
    row_valid = m > 0.5 * MASK_VALUE                               # dst has >= 1 in-edge
    p = jnp.exp(masked - jnp.where(row_valid, m, 0.0))             # non-edges underflow to 0
    denom = jnp.sum(p, axis=1, keepdims=True)
    inv = pl.reciprocal(jnp.maximum(denom, 1.0), approx=True)      # EUP slot, ~free
    esoft_ref[...] = jnp.where(row_valid, p * inv, 0.0)


# --------------------------------------------------------------------------------------
# Wrapper
# --------------------------------------------------------------------------------------
def gcn_layer(adj, feat, w_t, *, tile_m=128, tile_k=128):
    """adj: [N, N] (dst, src) 0/1; feat: [N, Fin]; w_t: [Fin, Fout] (= W^T)."""
    n, fin = feat.shape
    fout = w_t.shape[1]

    n_pad = _round_up(n, max(tile_m, tile_k, 128))   # lane-dense [N,N] tiles
    f_pad = _round_up(fout, 128)                     # lane-dense h / score contraction

    # Zero padding keeps the math exact (padded rows/cols contribute nothing and are
    # masked out of the softmax).  Adjacency goes to bf16 (exact for 0/1, halves HBM).
    adj_p = jnp.zeros((n_pad, n_pad), jnp.bfloat16).at[:n, :n].set(adj.astype(jnp.bfloat16))
    feat_p = jnp.zeros((n_pad, fin), jnp.float32).at[:n, :].set(feat.astype(jnp.float32))
    wt_p = jnp.zeros((fin, f_pad), jnp.float32).at[:, :fout].set(w_t.astype(jnp.float32))

    vmem_cap = 48 * 1024 * 1024  # headroom below v7x's 64 MiB physical VMEM

    # ---- h = A @ feat @ W^T ------------------------------------------------------------
    h_pad = pl.pallas_call(
        aggregate_kernel,
        grid=(n_pad // tile_m, n_pad // tile_k),
        in_specs=[
            pl.BlockSpec((tile_m, tile_k), lambda i, k: (i, k)),   # A tile (streamed)
            pl.BlockSpec((tile_k, fin), lambda i, k: (k, 0)),      # feat rows for this k
            pl.BlockSpec((fin, f_pad), lambda i, k: (0, 0)),       # W^T (resident)
        ],
        out_specs=pl.BlockSpec((tile_m, f_pad), lambda i, k: (i, 0)),
        out_shape=jax.ShapeDtypeStruct((n_pad, f_pad), jnp.float32),
        scratch_shapes=[pltpu.VMEM((tile_m, fin), jnp.float32)],
        compiler_params=pltpu.CompilerParams(
            dimension_semantics=("parallel", "arbitrary"),
            vmem_limit_bytes=vmem_cap),
    )(adj_p, feat_p, wt_p)

    # ---- edge scores + edge softmax (dense [N, N], grouped by destination rows) --------
    e_pad = pl.pallas_call(
        score_softmax_kernel,
        grid=(n_pad // tile_m,),
        in_specs=[
            pl.BlockSpec((tile_m, n_pad), lambda i: (i, 0)),       # A row strip (streamed)
            pl.BlockSpec((tile_m, f_pad), lambda i: (i, 0)),       # h for dst rows
            pl.BlockSpec((n_pad, f_pad), lambda i: (0, 0)),        # full h (resident)
        ],
        out_specs=pl.BlockSpec((tile_m, n_pad), lambda i: (i, 0)), # e_soft row strip
        out_shape=jax.ShapeDtypeStruct((n_pad, n_pad), jnp.float32),
        compiler_params=pltpu.CompilerParams(
            dimension_semantics=("parallel",),
            vmem_limit_bytes=vmem_cap),
    )(adj_p, h_pad, h_pad)

    return h_pad[:n, :fout], [e_pad[:n, :n]]


# --------------------------------------------------------------------------------------
# Pure-JAX reference (PyTorch/DGL semantics)
# --------------------------------------------------------------------------------------
def reference(adj, feat, w_t):
    h = jnp.dot(adj, jnp.dot(feat, w_t, precision=_PREC), precision=_PREC)
    s = jnp.dot(jnp.tanh(h), h.T, precision=_PREC)
    e = jnp.where(s > 0, s, NEGATIVE_SLOPE * s)
    mask = adj > 0
    e_m = jnp.where(mask, e, -jnp.inf)
    m = jnp.max(e_m, axis=1, keepdims=True)
    m = jnp.where(jnp.isfinite(m), m, 0.0)
    ex = jnp.where(mask, jnp.exp(e_m - m), 0.0)
    den = jnp.sum(ex, axis=1, keepdims=True)
    return h, jnp.where(den > 0, ex / den, 0.0)


if __name__ == "__main__":
    key = jax.random.PRNGKey(0)
    k_adj, k_feat, k_w = jax.random.split(key, 3)

    n_nodes, in_feats, out_feats = 200, 32, 16

    # Deterministic random graph (dense adjacency, self-loops added).
    adj = jax.random.bernoulli(k_adj, p=0.05, shape=(n_nodes, n_nodes))
    adj = jnp.logical_or(adj, jnp.eye(n_nodes, dtype=bool)).astype(jnp.float32)

    feat = 0.25 * jax.random.normal(k_feat, (n_nodes, in_feats), dtype=jnp.float32)

    # Xavier-normal init, gain = calculate_gain('leaky_relu', 0.2) = sqrt(2/(1+0.2^2)).
    gain = math.sqrt(2.0 / (1.0 + NEGATIVE_SLOPE ** 2))
    std = gain * math.sqrt(2.0 / (in_feats + out_feats))
    w = std * jax.random.normal(k_w, (out_feats, in_feats), dtype=jnp.float32)  # torch layout
    w_t = w.T  # [Fin, Fout]

    h, elist = gcn_layer(adj, feat, w_t)
    jax.block_until_ready((h, elist[0]))

    h_ref, e_ref = reference(adj, feat, w_t)
    assert jnp.allclose(h, h_ref, atol=2e-3, rtol=2e-3), \
        float(jnp.max(jnp.abs(h - h_ref)))
    # e_soft tolerance covers the approximate EUP reciprocal used for the denominator.
    assert jnp.allclose(elist[0], e_ref, atol=5e-3, rtol=5e-3), \
        float(jnp.max(jnp.abs(elist[0] - e_ref)))

    print("KERNEL_OK")
</pallas_src>

<mosaic_0001>
module attributes {stable_mosaic.version = 11 : i64} {
  func.func @aggregate_kernel(%arg0: i32, %arg1: i32, %arg2: memref<128x128xbf16, #tpu.memory_space<vmem>>, %arg3: memref<128x32xf32, #tpu.memory_space<vmem>>, %arg4: memref<32x128xf32, #tpu.memory_space<vmem>>, %arg5: memref<128x128xf32, #tpu.memory_space<vmem>>, %arg6: memref<128x32xf32, #tpu.memory_space<vmem>>) attributes {dimension_semantics = [#tpu.dimension_semantics<parallel>, #tpu.dimension_semantics<arbitrary>], iteration_bounds = array<i64: 2, 2>, scalar_prefetch = 0 : i64, scratch_operands = 1 : i64, tpu.core_type = #tpu.core_type<tc>, window_params = [{transform_indices = @transform_0, window_bounds = array<i64: 128, 128>}, {transform_indices = @transform_1, window_bounds = array<i64: 128, 32>}, {pipeline_mode = #tpu.pipeline_mode<synchronous>, transform_indices = @transform_2, window_bounds = array<i64: 32, 128>}, {transform_indices = @transform_3, window_bounds = array<i64: 128, 128>}]} {
    %c0_i32 = arith.constant 0 : i32
    %0 = arith.cmpi eq, %arg1, %c0_i32 : i32
    %1 = arith.extui %0 : i1 to i32
    %c0_i32_0 = arith.constant 0 : i32
    %2 = arith.cmpi ne, %1, %c0_i32_0 : i32
    scf.if %2 {
      %cst_9 = arith.constant 0.000000e+00 : f32
      %13 = vector.broadcast %cst_9 : f32 to vector<128x32xf32>
      %c0_10 = arith.constant 0 : index
      %c0_11 = arith.constant 0 : index
      %14 = vector.load %arg6[%c0_10, %c0_11] : memref<128x32xf32, #tpu.memory_space<vmem>>, vector<128x32xf32>
      tpu.vector_store %arg6[%c0_10, %c0_11], %13 {strides = array<i32>} : memref<128x32xf32, #tpu.memory_space<vmem>>, vector<128x32xf32>,
    } else {
    }
    %c0 = arith.constant 0 : index
    %c0_1 = arith.constant 0 : index
    %3 = vector.load %arg6[%c0, %c0_1] : memref<128x32xf32, #tpu.memory_space<vmem>>, vector<128x32xf32>
    %c0_2 = arith.constant 0 : index
    %c0_3 = arith.constant 0 : index
    %4 = vector.load %arg2[%c0_2, %c0_3] : memref<128x128xbf16, #tpu.memory_space<vmem>>, vector<128x128xbf16>
    %5 = arith.extf %4 : vector<128x128xbf16> to vector<128x128xf32>
    %c0_4 = arith.constant 0 : index
    %c0_5 = arith.constant 0 : index
    %6 = vector.load %arg3[%c0_4, %c0_5] : memref<128x32xf32, #tpu.memory_space<vmem>>, vector<128x32xf32>
    %cst = arith.constant dense<0.000000e+00> : vector<128x32xf32>
    %7 = tpu.matmul %5, %6, %cst {dimension_numbers = #tpu.dot_dimension_numbers<[1], [0], [0], [1], [0, 0, 1, 1], [], []>, precision = #tpu.contract_precision<fp32>} : vector<128x128xf32>, vector<128x32xf32>, vector<128x32xf32> -> vector<128x32xf32>
    %8 = arith.addf %3, %7 : vector<128x32xf32>
    %c0_6 = arith.constant 0 : index
    %c0_7 = arith.constant 0 : index
    %9 = vector.load %arg6[%c0_6, %c0_7] : memref<128x32xf32, #tpu.memory_space<vmem>>, vector<128x32xf32>
    tpu.vector_store %arg6[%c0_6, %c0_7], %8 {strides = array<i32>} : memref<128x32xf32, #tpu.memory_space<vmem>>, vector<128x32xf32>,
    %c1_i32 = arith.constant 1 : i32
    %10 = arith.cmpi eq, %arg1, %c1_i32 : i32
    %11 = arith.extui %10 : i1 to i32
    %c0_i32_8 = arith.constant 0 : i32
    %12 = arith.cmpi ne, %11, %c0_i32_8 : i32
    scf.if %12 {
      %c0_9 = arith.constant 0 : index
      %c0_10 = arith.constant 0 : index
      %13 = vector.load %arg6[%c0_9, %c0_10] : memref<128x32xf32, #tpu.memory_space<vmem>>, vector<128x32xf32>
      %c0_11 = arith.constant 0 : index
      %c0_12 = arith.constant 0 : index
      %14 = vector.load %arg4[%c0_11, %c0_12] : memref<32x128xf32, #tpu.memory_space<vmem>>, vector<32x128xf32>
      %cst_13 = arith.constant dense<0.000000e+00> : vector<128x128xf32>
      %15 = tpu.matmul %13, %14, %cst_13 {dimension_numbers = #tpu.dot_dimension_numbers<[1], [0], [0], [1], [0, 0, 1, 1], [], []>, precision = #tpu.contract_precision<fp32>} : vector<128x32xf32>, vector<32x128xf32>, vector<128x128xf32> -> vector<128x128xf32>
      %c0_14 = arith.constant 0 : index
      %c0_15 = arith.constant 0 : index
      %16 = vector.load %arg5[%c0_14, %c0_15] : memref<128x128xf32, #tpu.memory_space<vmem>>, vector<128x128xf32>
      tpu.vector_store %arg5[%c0_14, %c0_15], %15 {strides = array<i32>} : memref<128x128xf32, #tpu.memory_space<vmem>>, vector<128x128xf32>,
    } else {
    }
    return
  }
  func.func @transform_0(%arg0: i32, %arg1: i32) -> (i32, i32) {
    %c0_i32 = arith.constant 0 : i32
    return %arg0, %arg1 : i32, i32
  }
  func.func @transform_1(%arg0: i32, %arg1: i32) -> (i32, i32) {
    %c0_i32 = arith.constant 0 : i32
    %c0_i32_0 = arith.constant 0 : i32
    return %arg1, %c0_i32 : i32, i32
  }
  func.func @transform_2(%arg0: i32, %arg1: i32) -> (i32, i32) {
    %c0_i32 = arith.constant 0 : i32
    %c0_i32_0 = arith.constant 0 : i32
    %c0_i32_1 = arith.constant 0 : i32
    return %c0_i32, %c0_i32_0 : i32, i32
  }
  func.func @transform_3(%arg0: i32, %arg1: i32) -> (i32, i32) {
    %c0_i32 = arith.constant 0 : i32
    %c0_i32_0 = arith.constant 0 : i32
    return %arg0, %c0_i32 : i32, i32
  }
}

</mosaic_0001>

<bundles_post_ra>
// kernel: tpu_custom_call.1
= control target key start
LH: loop header
LB: loop body
LE: loop exit
PB: predicated region body
PF: predicated region fallthrough
CT: control target
= control target key end

     0   :  { %8 = vsyncpa [#allocation5], 0  ;;  %s5520_s0 = inlined_call_operand.vmem [shape: bf16[256,256], index: 0, kind: input, shape index: {}]   ;;  %s5521_s1 = inlined_call_operand.vmem [shape: f32[256,32], index: 1, kind: input, shape index: {}]   ;;  %s5522_s2 = inlined_call_operand.vmem [shape: f32[32,128], index: 2, kind: input, shape index: {}]   ;;  %s5523_s3 = inlined_call_operand.hbm [shape: f32[256,128], index: 3, kind: output, shape index: {}]  }
   0x1   :  { %10 = vsyncpa [#allocation5 + $0x1], 0  ;;  %s4471_s12 = smov 0   ;;  %s4473_s13 = smov 0  }
   0x2   :  { %s4475_s14 = smov 0   ;;  %s4477_s15 = smov 0  }
   0x3   :  { %s4479_s16 = smov 0   ;;  %s4481_s17 = smov 0  }
   0x4   :  { %s4483_s18 = smov 0   ;;  %s4485_s19 = smov 0  }
   0x5   :  { %s4487_s20 = smov 0   ;;  %s4489_s21 = smov 0  }
   0x6 LB: > { %s2944_s22 = sadd.s32 4294967295, %s4445_s21   ;;  %s2945_s23 = sadd.s32 4294967294, %s4445_s21   ;;  %s4445_s21 = sphi %s4489_s21, %s16_s21   ;;  %s4441_s20 = sphi %s4487_s20, %s5651_s20   ;;  %s4437_s19 = sphi %s4485_s19, %s5650_s19   ;;  %s4433_s18 = sphi %s4483_s18, %s5649_s18   ;;  %s4429_s17 = sphi %s4481_s17, %s5648_s17   ;;  %s4425_s16 = sphi %s4479_s16, %s5647_s16   ;;  %s4421_s15 = sphi %s4477_s15, %s5646_s15   ;;  %s4417_s14 = sphi %s4475_s14, %s5645_s14   ;;  %s4413_s13 = sphi %s4473_s13, %s5644_s13   ;;  %s4409_s12 = sphi %s4471_s12, %s5643_s12  }
   0x7   : > { %s25_s24 = sadd.s32 1, %s4437_s19  ;;  %s28_s25 = sadd.s32 1, %s4441_s20 }
   0x8   : > { %p26_p0 = scmp.ge.s32.totalorder %s25_s24, 2  ;;  %s37_s26 = sadd.s32 1, %s4425_s16 }
   0x9   : > { %p44_p1 = scmp.ne.s32.totalorder %s4425_s16, %s4421_s15  ;;  %p45_p2 = scmp.eq.s32.totalorder %s4445_s21, 0 }
   0xa   : > { %s5653_s24 = smov (%p26_p0, %s25_s24), 0  ;;  %s5655_s25 = smov (!%p26_p0, %s28_s25), %s4441_s20 }
   0xb   : > { %s33_s27 = ssub.s32 %s4437_s19, %s5653_s24  ;;  %p4534_p3 = por %p45_p2, %p44_p1 }
   0xc   : > { %p30_p4 = scmp.ge.s32.totalorder %s5655_s25, 2  ;;  %s110_s29 = sadd.s32 1, %s4417_s14 }
   0xd   : > { %p120_p5 = scmp.ne.s32.totalorder %s4417_s14, %s4413_s13  ;;  %p121_p6 = scmp.eq.s32.totalorder %s2944_s22, 3 }
   0xe   : > { %s5657_s25 = smov (%p30_p4, %s5655_s25), 0  ;;  %p126_p8 = scmp.ne.s32.totalorder %s4413_s13, %s4409_s12 }
   0xf   : > { %p4543_p7 = por %p121_p6, %p120_p5  ;;  %s32_s4 = ssub.s32 %s4441_s20, %s5657_s25 }
  0x10   : > { %p127_p9 = scmp.eq.s32.totalorder %s2945_s23, 3  ;;  %s34_s5 = sor.u32 %s33_s27, %s32_s4 }
  0x11   : > { %p108_p10 = scmp.eq.s32.totalorder %s32_s4, 0  ;;  %p35_p11 = scmp.eq.s32.totalorder %s34_s5, 0 }
  0x12   : > { %p4551_p12 = por %p127_p9, %p126_p8  ;;  %p2947_p13 = scmp.ge.s32.totalorder %s4445_s21, 4 }
  0x13   : > { %s4556_s7 = scalar_select %p108_p10, %s4417_s14, %s110_s29  }
  0x14   : > { %s4559_s8 = scalar_select %p35_p11, %s4425_s16, %s37_s26  }
  0x15   : > { %146 = sbr.rel (%p2947_p13) target bundleno = 44 (0x2c), region = 20 }
  0x1c   : > { %149 = sbr.rel (!%p4534_p3) target bundleno = 44 (0x2c), region = 24  ;;  %s151_s9 = sand.u32 (%p4534_p3), 1, %s4425_s16  }
  0x1d   : > { %s2964_s10 = sshll.u32 (%p4534_p3), %s4441_s20, 5  ;;  %s2948_s11 = sshll.u32 (%p4534_p3), %s151_s9, 6 }
  0x1e   : > { %s156_s22 = sadd.s32 (%p4534_p3), %s4437_s19, %s2964_s10  ;;  %s153_s26 = scalar_lea.vmem (%p4534_p3), [#allocation3], %s2948_s11 }
  0x1f   : > { %s2951_s23 = sshll.u32 (%p4534_p3), %s156_s22, 2 }
  0x20   : > { %s4570_s29 = scalar_lea.vmem (%p4534_p3), %s5520_s0, %s2951_s23 }
  0x21   : > { %v174_v0 = vld [vmem:[%s4570_s29] sm:$0xf] (%p4534_p3)  ;;  %v176_v1 = vld [vmem:[%s4570_s29 + $0x8] sm:$0xf] (%p4534_p3)  ;;  %v178_v2 = vld [vmem:[%s4570_s29 + $0x10] sm:$0xf] (%p4534_p3) }
  0x22   : > { %175 = vst [vmem:[%s153_s26] sm:$0xf] (%p4534_p3), %v174_v0  ;;  %177 = vst [vmem:[%s153_s26 + $0x4] sm:$0xf] (%p4534_p3), %v176_v1  ;;  %v180_v3 = vld [vmem:[%s4570_s29 + $0x18] sm:$0xf] (%p4534_p3) }
  0x23   : > { %179 = vst [vmem:[%s153_s26 + $0x8] sm:$0xf] %v178_v2  ;;  %v182_v4 = vld [vmem:[%s4570_s29 + $0x20] sm:$0xf]  ;;  %v184_v5 = vld [vmem:[%s4570_s29 + $0x28] sm:$0xf] }
  0x24   : > { %181 = vst [vmem:[%s153_s26 + $0xc] sm:$0xf] %v180_v3  ;;  %183 = vst [vmem:[%s153_s26 + $0x10] sm:$0xf] %v182_v4  ;;  %v186_v6 = vld [vmem:[%s4570_s29 + $0x30] sm:$0xf] }
  0x25   : > { %185 = vst [vmem:[%s153_s26 + $0x14] sm:$0xf] %v184_v5  ;;  %v188_v7 = vld [vmem:[%s4570_s29 + $0x38] sm:$0xf]  ;;  %v190_v8 = vld [vmem:[%s4570_s29 + $0x40] sm:$0xf] }
  0x26   : > { %187 = vst [vmem:[%s153_s26 + $0x18] sm:$0xf] %v186_v6  ;;  %189 = vst [vmem:[%s153_s26 + $0x1c] sm:$0xf] %v188_v7  ;;  %v192_v9 = vld [vmem:[%s4570_s29 + $0x48] sm:$0xf] }
  0x27   : > { %191 = vst [vmem:[%s153_s26 + $0x20] sm:$0xf] %v190_v8  ;;  %v194_v10 = vld [vmem:[%s4570_s29 + $0x50] sm:$0xf]  ;;  %v196_v11 = vld [vmem:[%s4570_s29 + $0x58] sm:$0xf] }
  0x28   : > { %193 = vst [vmem:[%s153_s26 + $0x24] sm:$0xf] %v192_v9  ;;  %195 = vst [vmem:[%s153_s26 + $0x28] sm:$0xf] %v194_v10  ;;  %v198_v12 = vld [vmem:[%s4570_s29 + $0x60] sm:$0xf] }
  0x29   : > { %197 = vst [vmem:[%s153_s26 + $0x2c] sm:$0xf] %v196_v11  ;;  %v200_v13 = vld [vmem:[%s4570_s29 + $0x68] sm:$0xf]  ;;  %v202_v14 = vld [vmem:[%s4570_s29 + $0x70] sm:$0xf] }
  0x2a   : > { %199 = vst [vmem:[%s153_s26 + $0x30] sm:$0xf] %v198_v12  ;;  %201 = vst [vmem:[%s153_s26 + $0x34] sm:$0xf] %v200_v13  ;;  %v204_v15 = vld [vmem:[%s4570_s29 + $0x78] sm:$0xf] }
  0x2b   : > { %203 = vst [vmem:[%s153_s26 + $0x38] sm:$0xf] %v202_v14  ;;  %205 = vst [vmem:[%s153_s26 + $0x3c] sm:$0xf] %v204_v15 }
  0x2c PF: > { %p2952_p0 = scmp.ge.s32.totalorder %s4445_s21, 1  ;;  %p268_p1 = scmp.lt.s32.totalorder %s4445_s21, 5 }
  0x2e   : > { %p269_p2 = pnand %p2952_p0, %p268_p1 }
  0x30   : > { %272 = sbr.rel (%p269_p2) target bundleno = 749 (0x2ed), region = 69 }
  0x37   : > { %s275_s28 = sand.u32 1, %s4421_s15   ;;  %s300_s5 = sand.u32 1, %s4413_s13  }
  0x38   : > { %s2953_s9 = sshll.u32 %s275_s28, 6  ;;  %s2954_s10 = sshll.u32 %s300_s5, 7 }
  0x39   : > { %s2955_s11 = sshll.u32 %s4429_s17, 4  ;;  %s4600_s29 = scalar_lea.vmem [#allocation3], %s2953_s9 }
  0x3a   : > { %p305_p3 = scmp.lt.s32.totalorder %s2955_s11, 31  ;;  %s4602_s26 = scalar_lea.vmem [#allocation4], %s2954_s10 }
  0x3b   : > { %p2957_p4 = scmp.ne.s32.totalorder %s4429_s17, 0 }
  0x3c   : > { %s5659_s11 = smov (!%p305_p3, %s2955_s11), 31  ;;  %vm315_vm0 = vcmask (!%p2957_p4), 261120   ;;  %v4447_v16 = vmov (!%p2957_p4), 0.0  }
  0x3d   : > { %s2956_s22 = sshll.u32 %s5659_s11, 3  ;;  %314 = sbr.rel (%p2957_p4) target bundleno = 69 (0x45), region = 77  ;;  %316 = vst.msk [vmem:[#allocation2] sm:$0xff] (!%p2957_p4), %vm315_vm0, %v4447_v16  ;;  %317 = vst.msk [vmem:[#allocation2 + $0x8] sm:$0xff] (!%p2957_p4), %vm315_vm0, %v4447_v16 }
  0x3e   : > { %s4598_s4 = scalar_lea.vmem %s5521_s1, %s2956_s22  ;;  %318 = vst.msk [vmem:[#allocation2 + $0x10] sm:$0xff] (!%p2957_p4), %vm315_vm0, %v4447_v16  ;;  %319 = vst.msk [vmem:[#allocation2 + $0x18] sm:$0xff] (!%p2957_p4), %vm315_vm0, %v4447_v16 }
  0x3f   : > { %320 = vst.msk [vmem:[#allocation2 + $0x20] sm:$0xff] (!%p2957_p4), %vm315_vm0, %v4447_v16  ;;  %321 = vst.msk [vmem:[#allocation2 + $0x28] sm:$0xff] (!%p2957_p4), %vm315_vm0, %v4447_v16 }
  0x40   : > { %322 = vst.msk [vmem:[#allocation2 + $0x30] sm:$0xff] (!%p2957_p4), %vm315_vm0, %v4447_v16  ;;  %323 = vst.msk [vmem:[#allocation2 + $0x38] sm:$0xff] (!%p2957_p4), %vm315_vm0, %v4447_v16 }
  0x41   : > { %324 = vst.msk [vmem:[#allocation2 + $0x40] sm:$0xff] (!%p2957_p4), %vm315_vm0, %v4447_v16  ;;  %325 = vst.msk [vmem:[#allocation2 + $0x48] sm:$0xff] (!%p2957_p4), %vm315_vm0, %v4447_v16 }
  0x42   : > { %326 = vst.msk [vmem:[#allocation2 + $0x50] sm:$0xff] (!%p2957_p4), %vm315_vm0, %v4447_v16  ;;  %327 = vst.msk [vmem:[#allocation2 + $0x58] sm:$0xff] (!%p2957_p4), %vm315_vm0, %v4447_v16 }
  0x43   : > { %328 = vst.msk [vmem:[#allocation2 + $0x60] sm:$0xff] (!%p2957_p4), %vm315_vm0, %v4447_v16  ;;  %329 = vst.msk [vmem:[#allocation2 + $0x68] sm:$0xff] (!%p2957_p4), %vm315_vm0, %v4447_v16 }
  0x44   : > { %330 = vst.msk [vmem:[#allocation2 + $0x70] sm:$0xff] %vm315_vm0, %v4447_v16  ;;  %331 = vst.msk [vmem:[#allocation2 + $0x78] sm:$0xff] %vm315_vm0, %v4447_v16 }
  0x45 PF: > { %v380_v17 = vld [vmem:[%s4598_s4] sm:$0xff]  ;;  %v381_v18 = vld [vmem:[%s4598_s4 + $0x8] sm:$0xff]  ;;  %v382_v19 = vld [vmem:[%s4598_s4 + $0x10] sm:$0xff]  ;;  %vm1602_vm1 = vcmask 261120   ;;  %p2958_p5 = scmp.ne.s32.totalorder %s4429_s17, 1 }
  0x46   : > { %v397_v20 = vand.u32 4294901760, %v380_v17  ;;  %v400_v21 = vand.u32 4294901760, %v381_v18  ;;  %v383_v22 = vld [vmem:[%s4598_s4 + $0x18] sm:$0xff]  ;;  %v403_v23 = vand.u32 4294901760, %v382_v19  ;;  %v4626_v24 = vld [vmem:[%s4598_s4 + $0x20] sm:$0xff]  ;;  %v4629_v25 = vld [vmem:[%s4598_s4 + $0x28] sm:$0xff] }
  0x47   : > { %v406_v26 = vand.u32 4294901760, %v383_v22  ;;  %v409_v28 = vand.u32 4294901760, %v4626_v24  ;;  %v412_v29 = vand.u32 4294901760, %v4629_v25  ;;  %v4638_v31 = vld [vmem:[%s4598_s4 + $0x30] sm:$0xff]  ;;  %v4641_v32 = vld [vmem:[%s4598_s4 + $0x38] sm:$0xff]  ;;  %v2967_v33 = vld [vmem:[%s4600_s29] sm:$0xff]  }
  0x48   : > { %v4631_v27 = vpack.c.bf16 %v400_v21, %v397_v20  ;;  %v4648_v34 = vunpack.c.l.bf16 %v2967_v33  ;;  %v415_v36 = vand.u32 4294901760, %v4638_v31  ;;  %v418_v37 = vand.u32 4294901760, %v4641_v32  ;;  %v4661_v38 = vld [vmem:[%s4598_s4 + $0x40] sm:$0xff]  ;;  %v4664_v39 = vld [vmem:[%s4598_s4 + $0x48] sm:$0xff]  ;;  %v4686_v46 = vld [vmem:[%s4598_s4 + $0x50] sm:$0xff] }
  0x49   : > { %v4635_v30 = vpack.c.bf16 %v406_v26, %v403_v23  ;;  %v4656_v35 = vpack.c.bf16 %v412_v29, %v409_v28  ;;  %v4672_v41 = vunpack.c.h.bf16 %v2967_v33  ;;  %v421_v44 = vand.u32 4294901760, %v4661_v38  ;;  %v2998_v47 = vld [vmem:[%s4600_s29 + $0x8] sm:$0xff]   ;;  %v4690_v48 = vld [vmem:[%s4598_s4 + $0x58] sm:$0xff]  ;;  %v4701_v53 = vld [vmem:[%s4598_s4 + $0x60] sm:$0xff] }
  0x4a   : > { %3846 = vmatprep.subr.bf16.mxu1 %v4631_v27  ;;  %3942 = vmatprep.subr.bf16.mxu0 %v4631_v27  ;;  %v4668_v40 = vsub.f32 %v4648_v34, %v4648_v34  ;;  %v4681_v43 = vpack.c.bf16 %v418_v37, %v415_v36  ;;  %v424_v45 = vand.u32 4294901760, %v4664_v39  ;;  %v4693_v50 = vsub.f32 %v380_v17, %v397_v20  ;;  %v4704_v54 = vld [vmem:[%s4598_s4 + $0x68] sm:$0xff]  ;;  %v4722_v60 = vld [vmem:[%s4598_s4 + $0x70] sm:$0xff]  ;;  %v4725_v61 = vld [vmem:[%s4598_s4 + $0x78] sm:$0xff] }
  0x4b   : > { %3848 = vmatpush3.bf16.msra.mxu1 %v4631_v27  ;;  %3944 = vmatpush3.bf16.msra.mxu0 %v4631_v27  ;;  %v4695_v51 = vsub.f32 %v381_v18, %v400_v21  ;;  %v5532_v52 = vand.u32 4294901760, %v4686_v46  ;;  %v4708_v56 = vsub.f32 %v4672_v41, %v4672_v41  ;;  %v4710_v57 = vunpack.c.l.bf16 %v2998_v47  ;;  %v2999_v1 = vld [vmem:[%s4600_s29 + $0x10] sm:$0xff]   ;;  %v3000_v16 = vld [vmem:[%s4600_s29 + $0x18] sm:$0xff]  }
  0x4c   : > { %3850 = vmatprep.subr.bf16.mxu1 %v4635_v30  ;;  %3946 = vmatprep.subr.bf16.mxu0 %v4635_v30  ;;  %5569 = vst [vmem:[#allocation7_spill] sm:$0xff] %v4668_v40  ;;  %v478_v42 = vand.u32 4294901760, %v4668_v40  ;;  %v4718_v58 = vpack.c.bf16 %v424_v45, %v421_v44  ;;  %v5531_v59 = vand.u32 4294901760, %v4690_v48  ;;  %v4727_v62 = vunpack.c.h.bf16 %v2998_v47 }
  0x4d   : > { %5570 = vst [vmem:[#allocation8_spill] sm:$0xff] %v4708_v56  ;;  %v4729_v63 = vsub.f32 %v382_v19, %v403_v23  ;;  %v4731_v0 = vsub.f32 %v383_v22, %v406_v26  ;;  %v5527_v2 = vand.u32 4294901760, %v4701_v53  ;;  %v5526_v3 = vand.u32 4294901760, %v4704_v54 }
  0x4e   : > { %v479_v49 = vsub.f32 %v4668_v40, %v478_v42  ;;  %3517 = vmatprep.mubr.f32.mxu0 %v478_v42  ;;  %5571 = vst [vmem:[#allocation9_spill] sm:$0xff] %v4718_v58  ;;  %v624_v4 = vand.u32 4294901760, %v4693_v50  ;;  %v631_v5 = vand.u32 4294901760, %v4695_v51  ;;  %v5525_v6 = vand.u32 4294901760, %v4722_v60 }
  0x4f   : > { %3852 = vmatpush3.bf16.msra.mxu1 %v4635_v30  ;;  %3948 = vmatpush3.bf16.msra.mxu0 %v4635_v30  ;;  %v5524_v7 = vand.u32 4294901760, %v4725_v61  ;;  %v5529_v8 = vand.u32 4294901760, %v4708_v56  ;;  %v4745_v9 = vsub.f32 %v4710_v57, %v4710_v57  ;;  %v4753_v10 = vpack.c.bf16 %v5531_v59, %v5532_v52 }
  0x50   : > { %3854 = vmatprep.subr.bf16.mxu1 %v4656_v35  ;;  %3950 = vmatprep.subr.bf16.mxu0 %v4656_v35  ;;  %v480_v55 = vand.u32 4294901760, %v479_v49  ;;  %v4757_v11 = vsub.f32 %v4727_v62, %v4727_v62  ;;  %v638_v12 = vand.u32 4294901760, %v4729_v63  ;;  %v4760_v13 = vunpack.c.l.bf16 %v2999_v1 }
  0x51   : > { %5572 = vst [vmem:[#allocation10_spill] sm:$0xff] %v4745_v9  ;;  %5573 = vst [vmem:[#allocation11_spill] sm:$0xff] %v4753_v10  ;;  %v645_v14 = vand.u32 4294901760, %v4731_v0  ;;  %v4763_v15 = vunpack.c.h.bf16 %v2999_v1  ;;  %v625_v17 = vsub.f32 %v4693_v50, %v624_v4  ;;  %v632_v18 = vsub.f32 %v4695_v51, %v631_v5 }
  0x52   : > { %3349 = vmatprep.mubr.f32.mxu1 %v480_v55  ;;  %5574 = vst [vmem:[#allocation12_spill] sm:$0xff] %v4757_v11  ;;  %v4771_v19 = vsub.f32 %v4626_v24, %v409_v28  ;;  %v4776_v20 = vsub.f32 %v4629_v25, %v412_v29  ;;  %v4784_v21 = vpack.c.bf16 %v5526_v3, %v5527_v2  ;;  %v5528_v24 = vand.u32 4294901760, %v4745_v9 }
  0x53   : > { %3856 = vmatpush3.bf16.msra.mxu1 %v4656_v35  ;;  %3952 = vmatpush3.bf16.msra.mxu0 %v4656_v35  ;;  %v4790_v22 = vpack.c.bf16 %v5524_v7, %v5525_v6  ;;  %v4795_v23 = vsub.f32 %v4708_v56, %v5529_v8  ;;  %v5530_v25 = vand.u32 4294901760, %v4757_v11  ;;  %v639_v26 = vsub.f32 %v4729_v63, %v638_v12 }
  0x54   : > { %3858 = vmatprep.subr.bf16.mxu1 %v4681_v43  ;;  %3954 = vmatprep.subr.bf16.mxu0 %v4681_v43  ;;  %5575 = vst [vmem:[#allocation13_spill] sm:$0xff] %v4784_v21  ;;  %v4804_v28 = vsub.f32 %v4760_v13, %v4760_v13  ;;  %v4806_v29 = vunpack.c.l.bf16 %v3000_v16  ;;  %v646_v33 = vsub.f32 %v4731_v0, %v645_v14  ;;  %v4813_v47 = vunpack.c.h.bf16 %v3000_v16 }
  0x55   : > { %5576 = vst [vmem:[#allocation14_spill] sm:$0xff] %v4790_v22  ;;  %v4811_v42 = vsub.f32 %v4763_v15, %v4763_v15  ;;  %v4818_v49 = vsub.f32 %v4638_v31, %v415_v36  ;;  %v626_v55 = vand.u32 4294901760, %v625_v17  ;;  %v633_v1 = vand.u32 4294901760, %v632_v18  ;;  %v3001_v36 = vld [vmem:[%s4600_s29 + $0x20] sm:$0xff]  }
  0x56   : > { %5577 = vst [vmem:[#allocation15_spill] sm:$0xff] %v4804_v28  ;;  %5579 = vst [vmem:[#allocation17_spill] sm:$0xff] %v4813_v47  ;;  %v652_v7 = vand.u32 4294901760, %v4771_v19  ;;  %v659_v6 = vand.u32 4294901760, %v4776_v20  ;;  %v489_v3 = vand.u32 4294901760, %v4795_v23  ;;  %v3973_v2 = vpack.c.bf16 %v631_v5, %v624_v4 }
  0x57   : > { %3860 = vmatpush3.bf16.msra.mxu1 %v4681_v43  ;;  %3956 = vmatpush3.bf16.msra.mxu0 %v4681_v43  ;;  %5578 = vst [vmem:[#allocation16_spill] sm:$0xff] %v4811_v42  ;;  %v4828_v16 = vsub.f32 %v4745_v9, %v5528_v24  ;;  %v4833_v31 = vsub.f32 %v4641_v32, %v418_v37  ;;  %v640_v4 = vand.u32 4294901760, %v639_v26  ;;  %v5538_v5 = vand.u32 4294901760, %v4804_v28 }
  0x58   : > { %3862 = vmatprep.subr.bf16.mxu1 %v4718_v58  ;;  %3958 = vmatprep.subr.bf16.mxu0 %v4718_v58  ;;  %v4841_v17 = vsub.f32 %v4757_v11, %v5530_v25  ;;  %v4846_v18 = vsub.f32 %v4806_v29, %v4806_v29  ;;  %v647_v23 = vand.u32 4294901760, %v646_v33  ;;  %v4851_v37 = vsub.f32 %v4813_v47, %v4813_v47 }
  0x59   : > { %v3877_v8 = vpack.c.bf16 %v633_v1, %v626_v55  ;;  %v653_v25 = vsub.f32 %v4771_v19, %v652_v7  ;;  %v660_v26 = vsub.f32 %v4776_v20, %v659_v6  ;;  %v4856_v59 = vunpack.c.l.bf16 %v3001_v36 }
  0x5a   : > { %5580 = vst [vmem:[#allocation18_spill] sm:$0xff] %v4846_v18  ;;  %5581 = vst [vmem:[#allocation19_spill] sm:$0xff] %v4851_v37  ;;  %v498_v33 = vand.u32 4294901760, %v4828_v16  ;;  %v673_v52 = vand.u32 4294901760, %v4833_v31  ;;  %v4865_v24 = vsub.f32 %v4661_v38, %v421_v44  ;;  %v4870_v55 = vsub.f32 %v4664_v39, %v424_v45  ;;  %v3002_v44 = vld [vmem:[%s4600_s29 + $0x28] sm:$0xff]  }
  0x5b   : > { %3864 = vmatpush3.bf16.msra.mxu1 %v4718_v58  ;;  %3960 = vmatpush3.bf16.msra.mxu0 %v4718_v58  ;;  %5582 = vst [vmem:[#allocation20_spill] sm:$0xff] %v4856_v59  ;;  %v507_v1 = vand.u32 4294901760, %v4841_v17  ;;  %v3977_v32 = vpack.c.bf16 %v645_v14, %v638_v12  ;;  %v4878_v16 = vsub.f32 %v4804_v28, %v5538_v5  ;;  %v654_v14 = vand.u32 4294901760, %v653_v25 }
  0x5c   : > { %3866 = vmatprep.subr.bf16.mxu1 %v4753_v10  ;;  %3962 = vmatprep.subr.bf16.mxu0 %v4753_v10  ;;  %v3881_v40 = vpack.c.bf16 %v647_v23, %v640_v4  ;;  %v661_v17 = vand.u32 4294901760, %v660_v26  ;;  %v4893_v5 = vsub.f32 %v4856_v59, %v4856_v59  ;;  %v4895_v38 = vunpack.c.h.bf16 %v3001_v36 }
  0x5d   : > { %v516_v25 = vand.u32 4294901760, %v4878_v16  ;;  %v4905_v26 = vpack.c.bf16 %v659_v6, %v652_v7  ;;  %v5585_v36 = vand.u32 4294901760, %v4846_v18  ;;  %v5587_v4 = vand.u32 4294901760, %v4851_v37 }
  0x5e   : > { %v5588_v6 = vand.u32 4294901760, %v4690_v48  ;;  %v5589_v47 = vand.u32 4294901760, %v4708_v56  ;;  %v5598_v56 = vand.u32 4294901760, %v4757_v11 }
  0x5f   : > { %3868 = vmatpush3.bf16.msra.mxu1 %v4753_v10  ;;  %3964 = vmatpush3.bf16.msra.mxu0 %v4753_v10  ;;  %v5584_v10 = vand.u32 4294901760, %v4818_v49  ;;  %v4910_v45 = vsub.f32 %v4846_v18, %v5585_v36  ;;  %v4921_v59 = vsub.f32 %v4851_v37, %v5587_v4  ;;  %v3003_v36 = vld [vmem:[%s4600_s29 + $0x30] sm:$0xff]   ;;  %v4936_v4 = vunpack.c.h.bf16 %v3002_v44 }
  0x60   : > { %3870 = vmatprep.subr.bf16.mxu1 %v4784_v21  ;;  %3966 = vmatprep.subr.bf16.mxu0 %v4784_v21  ;;  %v4926_v7 = vsub.f32 %v4690_v48, %v5588_v6  ;;  %v5591_v48 = vand.u32 4294901760, %v4865_v24  ;;  %v5592_v6 = vand.u32 4294901760, %v4870_v55 }
  0x61   : > { %v667_v12 = vsub.f32 %v4818_v49, %v5584_v10  ;;  %v4902_v10 = vunpack.c.l.bf16 %v3002_v44  ;;  %5590 = vst [vmem:[#allocation21_spill] sm:$0xff] %v4936_v4  ;;  %v5593_v44 = vand.u32 4294901760, %v4745_v9  ;;  %v3004_v9 = vld [vmem:[%s4600_s29 + $0x38] sm:$0xff]  }
  0x63   : > { %3872 = vmatpush3.bf16.msra.mxu1 %v4784_v21  ;;  %3968 = vmatpush3.bf16.msra.mxu0 %v4784_v21  ;;  %v5583_v21 = vand.u32 4294901760, %v4811_v42  ;;  %v668_v16 = vand.u32 4294901760, %v667_v12 }
  0x64   : > { %3874 = vmatprep.subr.bf16.mxu1 %v4790_v22  ;;  %3970 = vmatprep.subr.bf16.mxu0 %v4790_v22 }
  0x65   : > { %v4885_v39 = vsub.f32 %v4811_v42, %v5583_v21  ;;  %v674_v21 = vsub.f32 %v4833_v31, %v673_v52 }
  0x67   : > { %3876 = vmatpush3.bf16.msra.mxu1 %v4790_v22  ;;  %3972 = vmatpush3.bf16.msra.mxu0 %v4790_v22  ;;  %v5586_v22 = vand.u32 4294901760, %v4686_v46  ;;  %v525_v23 = vand.u32 4294901760, %v4885_v39  ;;  %v4934_v39 = vsub.f32 %v4895_v38, %v4895_v38  ;;  %v675_v12 = vand.u32 4294901760, %v674_v21 }
  0x68   : > { %3878 = vmatprep.subr.bf16.mxu1 %v3877_v8  ;;  %3974 = vmatprep.subr.bf16.mxu0 %v3973_v2  ;;  %v5595_v21 = vand.u32 4294901760, %v4701_v53 }
  0x69   : > { %v4915_v58 = vsub.f32 %v4686_v46, %v5586_v22  ;;  %v3885_v46 = vpack.c.bf16 %v661_v17, %v654_v14  ;;  %v4946_v14 = vsub.f32 %v4902_v10, %v4902_v10  ;;  %v4952_v17 = vunpack.c.l.bf16 %v3003_v36 }
  0x6a   : > { %3350 = vmatmul.mubr.f32.vlgmr.msra.gmra.mrb[0].mxu1 %v489_v3  ;;  %3518 = vmatmul.mubr.f32.vlgmr.msra.gmra.mrb[0].mxu0 %v5589_v47  ;;  %v681_v3 = vsub.f32 %v4865_v24, %v5591_v48  ;;  %v688_v47 = vsub.f32 %v4870_v55, %v5592_v6  ;;  %v4957_v48 = vsub.f32 %v4701_v53, %v5595_v21  ;;  %v543_v6 = vand.u32 4294901760, %v4921_v59 }
  0x6b   : > { %3880 = vmatpush3.bf16.msra.mxu1 %v3877_v8  ;;  %3976 = vmatpush3.bf16.msra.mxu0 %v3973_v2  ;;  %v534_v2 = vand.u32 4294901760, %v4910_v45  ;;  %5594 = vst [vmem:[#allocation22_spill] sm:$0xff] %v4952_v17  ;;  %v5597_v45 = vand.u32 4294901760, %v4704_v54  ;;  %v5599_v53 = vand.u32 4294901760, %v4893_v5 }
  0x6c   : > { %3352 = vmatprep.mubr.f32.mxu1 %v498_v33  ;;  %3520 = vmatprep.mubr.f32.mxu0 %v5593_v44  ;;  %v5596_v33 = vand.u32 4294901760, %v4818_v49  ;;  %v701_v44 = vand.u32 4294901760, %v4926_v7 }
  0x6d   : > { %3882 = vmatprep.subr.bf16.mxu1 %v3881_v40  ;;  %3978 = vmatprep.subr.bf16.mxu0 %v3977_v32  ;;  %v4966_v8 = vsub.f32 %v4704_v54, %v5597_v45  ;;  %v551_v21 = vsub.f32 %v4893_v5, %v5599_v53  ;;  %v3889_v54 = vpack.c.bf16 %v675_v12, %v668_v16  ;;  %v682_v45 = vand.u32 4294901760, %v681_v3 }
  0x6e   : > { %v3985_v22 = vpack.c.bf16 %v673_v52, %v5596_v33  ;;  %3353 = vmatmul.mubr.f32.gmra.mrb[2].mxu1 %v507_v1  ;;  %3521 = vmatmul.mubr.f32.gmra.mrb[2].mxu0 %v5598_v56  ;;  %v4977_v52 = vsub.f32 %v4936_v4, %v4936_v4  ;;  %v4979_v33 = vunpack.c.h.bf16 %v3003_v36  ;;  %v689_v1 = vand.u32 4294901760, %v688_v47 }
  0x6f   : > { %3884 = vmatpush3.bf16.msra.mxu1 %v3881_v40  ;;  %3980 = vmatpush3.bf16.msra.mxu0 %v3977_v32  ;;  %v5602_v56 = vand.u32 4294901760, %v4804_v28  ;;  %v5603_v53 = vand.u32 4294901760, %v4915_v58  ;;  %v4989_v4 = vsub.f32 %v4952_v17, %v4952_v17  ;;  %v4992_v32 = vunpack.c.l.bf16 %v3004_v9 }
  0x70   : > { %5600 = vst [vmem:[#allocation23_spill] sm:$0xff] %v4977_v52  ;;  %5601 = vst [vmem:[#allocation24_spill] sm:$0xff] %v4979_v33  ;;  %3355 = vmatprep.mubr.f32.mxu1 %v516_v25  ;;  %3886 = vmatprep.subr.bf16.mxu1 %v3885_v46  ;;  %v702_v25 = vsub.f32 %v4926_v7, %v701_v44  ;;  %v715_v16 = vand.u32 4294901760, %v4966_v8  ;;  %v5605_v36 = vand.u32 4294901760, %v4722_v60  ;;  %v5606_v3 = vand.u32 4294901760, %v4725_v61 }
  0x71   : > { %3523 = vmatprep.mubr.f32.mxu0 %v5602_v56  ;;  %v695_v59 = vsub.f32 %v4915_v58, %v5603_v53  ;;  %5604 = vst [vmem:[#allocation25_spill] sm:$0xff] %v4992_v32  ;;  %3982 = vmatprep.subr.bf16.mxu0 %v4905_v26  ;;  %v5607_v56 = vand.u32 4294901760, %v4811_v42  ;;  %v5608_v53 = vand.u32 4294901760, %v4934_v39  ;;  %v577_v11 = vand.u32 4294901760, %v4977_v52 }
  0x72   : > { %v5000_v12 = vsub.f32 %v4722_v60, %v5605_v36  ;;  %v5005_v47 = vsub.f32 %v4725_v61, %v5606_v3  ;;  %3356 = vmatmul.mubr.f32.gmra.mrb[4].mxu1 %v525_v23  ;;  %v5015_v28 = vsub.f32 %v4979_v33, %v4979_v33  ;;  %v5017_v60 = vunpack.c.h.bf16 %v3004_v9 }
  0x73   : > { %3524 = vmatmul.mubr.f32.gmra.mrb[4].mxu0 %v5607_v56  ;;  %v560_v40 = vsub.f32 %v4934_v39, %v5608_v53  ;;  %3888 = vmatpush3.bf16.msra.mxu1 %v3885_v46  ;;  %v552_v61 = vand.u32 4294901760, %v551_v21  ;;  %v3893_v23 = vpack.c.bf16 %v689_v1, %v682_v45  ;;  %v5611_v36 = vand.u32 4294901760, %v4865_v24 }
  0x74   : > { %5609 = vst [vmem:[#allocation26_spill] sm:$0xff] %v5015_v28  ;;  %5610 = vst [vmem:[#allocation27_spill] sm:$0xff] %v5017_v60  ;;  %3984 = vmatpush3.bf16.msra.mxu0 %v4905_v26  ;;  %v5612_v3 = vand.u32 4294901760, %v4870_v55  ;;  %v5613_v53 = vand.u32 4294901760, %v4946_v14  ;;  %3358 = vmatprep.mubr.f32.mxu1 %v534_v2  ;;  %v5614_v33 = vand.u32 4294901760, %v4846_v18  ;;  %v696_v9 = vand.u32 4294901760, %v695_v59 }
  0x75   : > { %v586_v46 = vand.u32 4294901760, %v4989_v4  ;;  %v5615_v26 = vand.u32 4294901760, %v4957_v48  ;;  %v5035_v45 = vsub.f32 %v4992_v32, %v4992_v32  ;;  %3890 = vmatprep.subr.bf16.mxu1 %v3889_v54  ;;  %3986 = vmatprep.subr.bf16.mxu0 %v3985_v22  ;;  %v703_v1 = vand.u32 4294901760, %v702_v25 }
  0x76   : > { %v3989_v56 = vpack.c.bf16 %v5612_v3, %v5611_v36  ;;  %v569_v42 = vsub.f32 %v4946_v14, %v5613_v53  ;;  %3526 = vmatprep.mubr.f32.mxu0 %v5614_v33  ;;  %v716_v36 = vsub.f32 %v4966_v8, %v715_v16  ;;  %v722_v2 = vand.u32 4294901760, %v5000_v12  ;;  %3359 = vmatmul.mubr.f32.gmra.mrb[6].mxu1 %v543_v6 }
  0x77   : > { %v709_v21 = vsub.f32 %v4957_v48, %v5615_v26  ;;  %v729_v33 = vand.u32 4294901760, %v5005_v47  ;;  %v5616_v59 = vand.u32 4294901760, %v4851_v37  ;;  %v561_v3 = vand.u32 4294901760, %v560_v40  ;;  %3892 = vmatpush3.bf16.msra.mxu1 %v3889_v54  ;;  %3361 = vmatprep.mubr.f32.mxu1 %v552_v61 }
  0x78   : > { %v578_v53 = vsub.f32 %v4977_v52, %v577_v11  ;;  %v595_v26 = vand.u32 4294901760, %v5015_v28  ;;  %v5046_v18 = vsub.f32 %v5017_v60, %v5017_v60  ;;  %3988 = vmatpush3.bf16.msra.mxu0 %v3985_v22  ;;  %v570_v25 = vand.u32 4294901760, %v569_v42  ;;  %3894 = vmatprep.subr.bf16.mxu1 %v3893_v23 }
  0x79   : > { %3527 = vmatmul.mubr.f32.gmra.mrb[6].mxu0 %v5616_v59  ;;  %v5617_v32 = vand.u32 4294901760, %v4893_v5  ;;  %v5618_v6 = vand.u32 4294901760, %v4915_v58  ;;  %v587_v40 = vsub.f32 %v4989_v4, %v586_v46  ;;  %v710_v59 = vand.u32 4294901760, %v709_v21  ;;  %3990 = vmatprep.subr.bf16.mxu0 %v3989_v56 }
  0x7a   : > { %v604_v52 = vand.u32 4294901760, %v5035_v45  ;;  %v3897_v17 = vpack.c.bf16 %v703_v1, %v696_v9  ;;  %v717_v60 = vand.u32 4294901760, %v716_v36  ;;  %v723_v54 = vsub.f32 %v5000_v12, %v722_v2  ;;  %3362 = vmatmul.mubr.f32.gmra.mrb[8].mxu1 %v561_v3 }
  0x7b   : > { %3529 = vmatprep.mubr.f32.mxu0 %v5617_v32  ;;  %v3993_v37 = vpack.c.bf16 %v701_v44, %v5618_v6  ;;  %v730_v42 = vsub.f32 %v5005_v47, %v729_v33  ;;  %v5619_v22 = vand.u32 4294901760, %v4934_v39  ;;  %v579_v32 = vand.u32 4294901760, %v578_v53  ;;  %3896 = vmatpush3.bf16.msra.mxu1 %v3893_v23 }
  0x7c   : > { %v596_v44 = vsub.f32 %v5015_v28, %v595_v26  ;;  %v613_v61 = vand.u32 4294901760, %v5046_v18  ;;  %3992 = vmatpush3.bf16.msra.mxu0 %v3989_v56  ;;  %3364 = vmatprep.mubr.f32.mxu1 %v570_v25  ;;  %v5620_v21 = vand.u32 4294901760, %v4946_v14  ;;  %v588_v9 = vand.u32 4294901760, %v587_v40 }
  0x7d   : > { %3530 = vmatmul.mubr.f32.gmra.mrb[8].mxu0 %v5619_v22  ;;  %v605_v1 = vsub.f32 %v5035_v45, %v604_v52  ;;  %3898 = vmatprep.subr.bf16.mxu1 %v3897_v17  ;;  %v3901_v36 = vpack.c.bf16 %v717_v60, %v710_v59  ;;  %v5621_v3 = vand.u32 4294901760, %v4957_v48  ;;  %v724_v53 = vand.u32 4294901760, %v723_v54 }
  0x7e   : > { %3532 = vmatprep.mubr.f32.mxu0 %v5620_v21  ;;  %3994 = vmatprep.subr.bf16.mxu0 %v3993_v37  ;;  %v731_v22 = vand.u32 4294901760, %v730_v42  ;;  %v597_v28 = vand.u32 4294901760, %v596_v44  ;;  %v614_v23 = vsub.f32 %v5046_v18, %v613_v61  ;;  %v4001_v40 = vpack.c.bf16 %v729_v33, %v722_v2  ;;  %v335_v2 = vld [vmem:[#allocation2 + $0x18] sm:$0xff] }
  0x7f   : > { %v3997_v6 = vpack.c.bf16 %v715_v16, %v5621_v3  ;;  %3365 = vmatmul.mubr.f32.gmra.mrb[10].mxu1 %v579_v32  ;;  %v606_v56 = vand.u32 4294901760, %v605_v1  ;;  %v5637_v16 = vld [vmem:[#allocation15_spill] sm:$0xff] }
  0x80   : > { %3900 = vmatpush3.bf16.msra.mxu1 %v3897_v17  ;;  %3996 = vmatpush3.bf16.msra.mxu0 %v3993_v37  ;;  %v3905_v25 = vpack.c.bf16 %v731_v22, %v724_v53  ;;  %v615_v60 = vand.u32 4294901760, %v614_v23  ;;  %v5630_v37 = vld [vmem:[#allocation25_spill] sm:$0xff]  ;;  %v5634_v17 = vld [vmem:[#allocation8_spill] sm:$0xff] }
  0x81   : > { %3533 = vmatmul.mubr.f32.gmra.mrb[10].mxu0 %v577_v11  ;;  %3367 = vmatprep.mubr.f32.mxu1 %v588_v9  ;;  %v3909_v11 = vpack.c.bf16 %v4695_v51, %v4693_v50  ;;  %v3917_v50 = vpack.c.bf16 %v4776_v20, %v4771_v19  ;;  %v5622_v51 = vld [vmem:[#allocation17_spill] sm:$0xff]  ;;  %v3933_v19 = vpack.c.bf16 %v4966_v8, %v4957_v48  ;;  %v5633_v8 = vld [vmem:[#allocation7_spill] sm:$0xff]  ;;  %v5635_v48 = vld [vmem:[#allocation10_spill] sm:$0xff] }
  0x82   : > { %3535 = vmatprep.mubr.f32.mxu0 %v586_v46  ;;  %3902 = vmatprep.subr.bf16.mxu1 %v3901_v36  ;;  %v5626_v20 = vld [vmem:[#allocation21_spill] sm:$0xff] }
  0x83   : > { %3998 = vmatprep.subr.bf16.mxu0 %v3997_v6  ;;  %3368 = vmatmul.mubr.f32.gmra.mrb[12].mxu1 %v597_v28  ;;  %v3913_v28 = vpack.c.bf16 %v4731_v0, %v4729_v63  ;;  %v5623_v63 = vld [vmem:[#allocation20_spill] sm:$0xff]  ;;  %v3929_v0 = vpack.c.bf16 %v4926_v7, %v4915_v58  ;;  %v5627_v58 = vld [vmem:[#allocation22_spill] sm:$0xff]  ;;  %v5632_v7 = vld [vmem:[#allocation27_spill] sm:$0xff] }
  0x84   : > { %3904 = vmatpush3.bf16.msra.mxu1 %v3901_v36  ;;  %4000 = vmatpush3.bf16.msra.mxu0 %v3997_v6  ;;  %v336_v36 = vld [vmem:[#allocation2 + $0x20] sm:$0xff] }
  0x85   : > { %3536 = vmatmul.mubr.f32.gmra.mrb[12].mxu0 %v595_v26  ;;  %3370 = vmatprep.mubr.f32.mxu1 %v606_v56  ;;  %v334_v26 = vld [vmem:[#allocation2 + $0x10] sm:$0xff]  ;;  %v339_v56 = vld [vmem:[#allocation2 + $0x38] sm:$0xff] }
  0x86   : > { %3538 = vmatprep.mubr.f32.mxu0 %v604_v52  ;;  %3906 = vmatprep.subr.bf16.mxu1 %v3905_v25  ;;  %v5636_v52 = vld [vmem:[#allocation12_spill] sm:$0xff] }
  0x87   : > { %4002 = vmatprep.subr.bf16.mxu0 %v4001_v40  ;;  %3371 = vmatmul.mubr.f32.gmra.mrb[14].mxu1 %v615_v60 }
  0x88   : > { %3908 = vmatpush3.bf16.msra.mxu1 %v3905_v25  ;;  %4004 = vmatpush3.bf16.msra.mxu0 %v4001_v40 }
  0x89   : > { %3539 = vmatmul.mubr.f32.gmra.mrb[14].mxu0 %v613_v61  ;;  %3405 = vmatprep.mubr.f32.mxu1 %v4648_v34  ;;  %v337_v61 = vld [vmem:[#allocation2 + $0x28] sm:$0xff] }
  0x8a   : > { %3573 = vmatprep.mubr.f32.mxu0 %v4648_v34  ;;  %3910 = vmatprep.subr.bf16.mxu1 %v3909_v11 }
  0x8b   : > { %4006 = vmatprep.subr.bf16.mxu0 %v4631_v27  ;;  %3406 = vmatmul.mubr.f32.vlgmr.msra.gmra.mrb[0].mxu1 %v4672_v41 }
  0x8c   : > { %3912 = vmatpush3.bf16.msra.mxu1 %v3909_v11  ;;  %3408 = vmatprep.mubr.f32.mxu1 %v4710_v57  ;;  %v338_v11 = vld [vmem:[#allocation2 + $0x30] sm:$0xff] }
  0x8d   : > { %3574 = vmatmul.mubr.f32.vlgmr.msra.gmra.mrb[0].mxu0 %v4672_v41  ;;  %3914 = vmatprep.subr.bf16.mxu1 %v3913_v28 }
  0x8e   : > { %4008 = vmatpush3.bf16.msra.mxu0 %v4631_v27  ;;  %3576 = vmatprep.mubr.f32.mxu0 %v4710_v57  ;;  %v3921_v27 = vpack.c.bf16 %v4833_v31, %v4818_v49  ;;  %v3937_v49 = vpack.c.bf16 %v5005_v47, %v5000_v12  ;;  %v5629_v31 = vld [vmem:[#allocation24_spill] sm:$0xff] }
  0x8f   : > { %4010 = vmatprep.subr.bf16.mxu0 %v4635_v30  ;;  %3409 = vmatmul.mubr.f32.gmra.mrb[2].mxu1 %v4727_v62  ;;  %v5638_v12 = vld [vmem:[#allocation16_spill] sm:$0xff] }
  0x90   : > { %3916 = vmatpush3.bf16.msra.mxu1 %v3913_v28  ;;  %3411 = vmatprep.mubr.f32.mxu1 %v4760_v13 }
  0x91   : > { %3577 = vmatmul.mubr.f32.gmra.mrb[2].mxu0 %v4727_v62  ;;  %3918 = vmatprep.subr.bf16.mxu1 %v3917_v50 }
  0x92   : > { %4012 = vmatpush3.bf16.msra.mxu0 %v4635_v30  ;;  %3579 = vmatprep.mubr.f32.mxu0 %v4760_v13  ;;  %v3925_v30 = vpack.c.bf16 %v4870_v55, %v4865_v24  ;;  %v5628_v24 = vld [vmem:[#allocation13_spill] sm:$0xff]  ;;  %v5631_v55 = vld [vmem:[#allocation14_spill] sm:$0xff] }
  0x93   : > { %4014 = vmatprep.subr.bf16.mxu0 %v4656_v35  ;;  %3412 = vmatmul.mubr.f32.gmra.mrb[4].mxu1 %v4763_v15 }
  0x94   : > { %3920 = vmatpush3.bf16.msra.mxu1 %v3917_v50  ;;  %3414 = vmatprep.mubr.f32.mxu1 %v4806_v29 }
  0x95   : > { %3580 = vmatmul.mubr.f32.gmra.mrb[4].mxu0 %v4763_v15  ;;  %3922 = vmatprep.subr.bf16.mxu1 %v3921_v27 }
  0x96   : > { %4016 = vmatpush3.bf16.msra.mxu0 %v4656_v35  ;;  %3582 = vmatprep.mubr.f32.mxu0 %v4806_v29  ;;  %v5624_v35 = vld [vmem:[#allocation9_spill] sm:$0xff] }
  0x97   : > { %4018 = vmatprep.subr.bf16.mxu0 %v4681_v43  ;;  %3415 = vmatmul.mubr.f32.gmra.mrb[6].mxu1 %v5622_v51 }
  0x98   : > { %3924 = vmatpush3.bf16.msra.mxu1 %v3921_v27  ;;  %3417 = vmatprep.mubr.f32.mxu1 %v5623_v63 }
  0x99   : > { %3583 = vmatmul.mubr.f32.gmra.mrb[6].mxu0 %v5622_v51  ;;  %3926 = vmatprep.subr.bf16.mxu1 %v3925_v30 }
  0x9a   : > { %4020 = vmatpush3.bf16.msra.mxu0 %v4681_v43  ;;  %3585 = vmatprep.mubr.f32.mxu0 %v5623_v63  ;;  %v5625_v43 = vld [vmem:[#allocation11_spill] sm:$0xff] }
  0x9b   : > { %4022 = vmatprep.subr.bf16.mxu0 %v5624_v35  ;;  %3418 = vmatmul.mubr.f32.gmra.mrb[8].mxu1 %v4895_v38 }
  0x9c   : > { %3928 = vmatpush3.bf16.msra.mxu1 %v3925_v30  ;;  %3420 = vmatprep.mubr.f32.mxu1 %v4902_v10 }
  0x9d   : > { %3586 = vmatmul.mubr.f32.gmra.mrb[8].mxu0 %v4895_v38  ;;  %3930 = vmatprep.subr.bf16.mxu1 %v3929_v0 }
  0x9e   : > { %4024 = vmatpush3.bf16.msra.mxu0 %v5624_v35  ;;  %3588 = vmatprep.mubr.f32.mxu0 %v4902_v10 }
  0x9f   : > { %4026 = vmatprep.subr.bf16.mxu0 %v5625_v43  ;;  %3421 = vmatmul.mubr.f32.gmra.mrb[10].mxu1 %v5626_v20 }
  0xa0   : > { %3932 = vmatpush3.bf16.msra.mxu1 %v3929_v0  ;;  %3423 = vmatprep.mubr.f32.mxu1 %v5627_v58 }
  0xa1   : > { %3589 = vmatmul.mubr.f32.gmra.mrb[10].mxu0 %v5626_v20  ;;  %3934 = vmatprep.subr.bf16.mxu1 %v3933_v19 }
  0xa2   : > { %4028 = vmatpush3.bf16.msra.mxu0 %v5625_v43  ;;  %3591 = vmatprep.mubr.f32.mxu0 %v5627_v58 }
  0xa3   : > { %4030 = vmatprep.subr.bf16.mxu0 %v5628_v24  ;;  %3424 = vmatmul.mubr.f32.gmra.mrb[12].mxu1 %v5629_v31 }
  0xa4   : > { %3936 = vmatpush3.bf16.msra.mxu1 %v3933_v19  ;;  %3426 = vmatprep.mubr.f32.mxu1 %v5630_v37  ;;  %v340_v19 = vld [vmem:[#allocation2 + $0x40] sm:$0xff] }
  0xa5   : > { %3592 = vmatmul.mubr.f32.gmra.mrb[12].mxu0 %v5629_v31  ;;  %3938 = vmatprep.subr.bf16.mxu1 %v3937_v49 }
  0xa6   : > { %4032 = vmatpush3.bf16.msra.mxu0 %v5628_v24  ;;  %3594 = vmatprep.mubr.f32.mxu0 %v5630_v37 }
  0xa7   : > { %4034 = vmatprep.subr.bf16.mxu0 %v5631_v55  ;;  %3427 = vmatmul.mubr.f32.gmra.mrb[14].mxu1 %v5632_v7 }
  0xa8   : > { %3940 = vmatpush3.bf16.msra.mxu1 %v3937_v49  ;;  %3461 = vmatprep.mubr.f32.mxu1 %v5633_v8 }
  0xa9   : > { %3595 = vmatmul.mubr.f32.gmra.mrb[14].mxu0 %v5632_v7 }
  0xaa   : > { %4036 = vmatpush3.bf16.msra.mxu0 %v5631_v55  ;;  %3629 = vmatprep.mubr.f32.mxu0 %v4648_v34  ;;  %v5639_v34 = vld [vmem:[#allocation18_spill] sm:$0xff] }
  0xab   : > { %3462 = vmatmul.mubr.f32.vlgmr.msra.gmra.mrb[0].mxu1 %v5634_v17  ;;  %v342_v17 = vld [vmem:[#allocation2 + $0x50] sm:$0xff] }
  0xac   : > { %3464 = vmatprep.mubr.f32.mxu1 %v5635_v48 }
  0xad   : > { %3630 = vmatmul.mubr.f32.vlgmr.msra.gmra.mrb[0].mxu0 %v4672_v41  ;;  %v5640_v41 = vld [vmem:[#allocation19_spill] sm:$0xff] }
  0xae   : > { %3632 = vmatprep.mubr.f32.mxu0 %v4710_v57  ;;  %v5641_v57 = vld [vmem:[#allocation23_spill] sm:$0xff] }
  0xaf   : > { %3465 = vmatmul.mubr.f32.gmra.mrb[2].mxu1 %v5636_v52 }
  0xb0   : > { %3467 = vmatprep.mubr.f32.mxu1 %v5637_v16 }
  0xb1   : > { %3633 = vmatmul.mubr.f32.gmra.mrb[2].mxu0 %v4727_v62  ;;  %v5642_v62 = vld [vmem:[#allocation26_spill] sm:$0xff] }
  0xb2   : > { %3635 = vmatprep.mubr.f32.mxu0 %v4760_v13 }
  0xb3   : > { %3468 = vmatmul.mubr.f32.gmra.mrb[4].mxu1 %v5638_v12 }
  0xb4   : > { %3470 = vmatprep.mubr.f32.mxu1 %v5639_v34 }
  0xb5   : > { %3636 = vmatmul.mubr.f32.gmra.mrb[4].mxu0 %v4763_v15  ;;  %v333_v15 = vld [vmem:[#allocation2 + $0x8] sm:$0xff] }
  0xb6   : > { %3638 = vmatprep.mubr.f32.mxu0 %v4806_v29 }
  0xb7   : > { %3471 = vmatmul.mubr.f32.gmra.mrb[6].mxu1 %v5640_v41  ;;  %v345_v41 = vld [vmem:[#allocation2 + $0x68] sm:$0xff] }
  0xb8   : > { %3473 = vmatprep.mubr.f32.mxu1 %v4893_v5 }
  0xb9   : > { %3639 = vmatmul.mubr.f32.gmra.mrb[6].mxu0 %v5622_v51 }
  0xba   : > { %3641 = vmatprep.mubr.f32.mxu0 %v5623_v63  ;;  %v341_v63 = vld [vmem:[#allocation2 + $0x48] sm:$0xff] }
  0xbb   : > { %3474 = vmatmul.mubr.f32.gmra.mrb[8].mxu1 %v4934_v39 }
  0xbc   : > { %3476 = vmatprep.mubr.f32.mxu1 %v4946_v14 }
  0xbd   : > { %3642 = vmatmul.mubr.f32.gmra.mrb[8].mxu0 %v4895_v38 }
  0xbe   : > { %3644 = vmatprep.mubr.f32.mxu0 %v4902_v10  ;;  %v332_v10 = vld [vmem:[#allocation2] sm:$0xff] }
  0xbf   : > { %3477 = vmatmul.mubr.f32.gmra.mrb[10].mxu1 %v5641_v57 }
  0xc0   : > { %3479 = vmatprep.mubr.f32.mxu1 %v4989_v4 }
  0xc1   : > { %3645 = vmatmul.mubr.f32.gmra.mrb[10].mxu0 %v5626_v20 }
  0xc2   : > { %3647 = vmatprep.mubr.f32.mxu0 %v5627_v58 }
  0xc3   : > { %3480 = vmatmul.mubr.f32.gmra.mrb[12].mxu1 %v5642_v62 }
  0xc4   : > { %3482 = vmatprep.mubr.f32.mxu1 %v5035_v45 }
  0xc5   : > { %3648 = vmatmul.mubr.f32.gmra.mrb[12].mxu0 %v5629_v31 }
  0xc6   : > { %3650 = vmatprep.mubr.f32.mxu0 %v5630_v37  ;;  %v343_v37 = vld [vmem:[#allocation2 + $0x58] sm:$0xff] }
  0xc7   : > { %3483 = vmatmul.mubr.f32.gmra.mrb[14].mxu1 %v5046_v18 }
  0xc9   : > { %3651 = vmatmul.mubr.f32.gmra.mrb[14].mxu0 %v5632_v7 }
 0x17e   : > { %v3463_v13 = vpop.f32.mrb[0].mxu1 }
 0x17f   : > { %v945_v38 = vpop.f32.mrb[1].mxu1 }
 0x180   : > { %v3631_v29 = vpop.f32.mrb[0].mxu0 }
 0x181   : > { %v4085_v5 = vadd.f32 %v3631_v29, %v3463_v13  ;;  %v1507_v39 = vpop.f32.mrb[1].mxu0 }
 0x182   : > { %v4086_v4 = vadd.f32 %v1507_v39, %v945_v38  ;;  %v3466_v46 = vpop.f32.mrb[2].mxu1 }
 0x183   : > { %v1587_v14 = vadd.f32 %v4085_v5, %v333_v15  ;;  %v957_v18 = vpop.f32.mrb[3].mxu1  ;;  %v344_v15 = vld [vmem:[#allocation2 + $0x60] sm:$0xff] }
 0x184   : > { %v1586_v47 = vadd.f32 %v4086_v4, %v332_v10  ;;  %v3634_v45 = vpop.f32.mrb[2].mxu0  ;;  %v347_v4 = vld [vmem:[#allocation2 + $0x78] sm:$0xff] }
 0x185   : > { %1604 = vst.msk [vmem:[#allocation2 + $0x8] sm:$0xff] %vm1602_vm1, %v1587_v14  ;;  %v4087_v33 = vadd.f32 %v3634_v45, %v3466_v46  ;;  %v1517_v59 = vpop.f32.mrb[3].mxu0 }
 0x186   : > { %1603 = vst.msk [vmem:[#allocation2] sm:$0xff] %vm1602_vm1, %v1586_v47  ;;  %v4088_v54 = vadd.f32 %v1517_v59, %v957_v18  ;;  %v3469_v44 = vpop.f32.mrb[4].mxu1  ;;  %v1639_v59 = vld [vmem:[%s5522_s2] sm:$0xff] (!%p2958_p5) }
 0x187   : > { %v1589_v42 = vadd.f32 %v4087_v33, %v335_v2  ;;  %v969_v1 = vpop.f32.mrb[5].mxu1  ;;  %v346_v2 = vld [vmem:[#allocation2 + $0x70] sm:$0xff] }
 0x188   : > { %v1588_v32 = vadd.f32 %v4088_v54, %v334_v26  ;;  %v3637_v21 = vpop.f32.mrb[4].mxu0  ;;  %v1640_v54 = vld [vmem:[%s5522_s2 + $0x8] sm:$0xff] (!%p2958_p5) }
 0x189   : > { %1606 = vst.msk [vmem:[#allocation2 + $0x18] sm:$0xff] %vm1602_vm1, %v1589_v42  ;;  %v4089_v9 = vadd.f32 %v3637_v21, %v3469_v44  ;;  %v1527_v3 = vpop.f32.mrb[5].mxu0  ;;  %v5188_v42 = vld [vmem:[%s5522_s2 + $0x10] sm:$0xff] (!%p2958_p5)  ;;  %v1695_v44 = vand.u32 (!%p2958_p5), 4294901760, %v1640_v54 }
 0x18a   : > { %1605 = vst.msk [vmem:[#allocation2 + $0x10] sm:$0xff] %vm1602_vm1, %v1588_v32  ;;  %v4090_v6 = vadd.f32 %v1527_v3, %v969_v1  ;;  %v3472_v23 = vpop.f32.mrb[6].mxu1  ;;  %v1692_v32 = vand.u32 (!%p2958_p5), 4294901760, %v1639_v59  ;;  %v1698_v21 = vand.u32 (!%p2958_p5), 4294901760, %v5188_v42 }
 0x18b   : > { %v1591_v53 = vadd.f32 %v4089_v9, %v337_v61  ;;  %v981_v60 = vpop.f32.mrb[7].mxu1  ;;  %v5193_v61 = vld [vmem:[%s5522_s2 + $0x18] sm:$0xff] (!%p2958_p5) }
 0x18c   : > { %v1590_v22 = vadd.f32 %v4090_v6, %v336_v36  ;;  %v3640_v25 = vpop.f32.mrb[6].mxu0  ;;  %v1624_v1 = vld [vmem:[#allocation2 + $0x8] sm:$0xff] (!%p2958_p5)  ;;  %v1701_v36 = vand.u32 (!%p2958_p5), 4294901760, %v5193_v61 }
 0x18d   : > { %1608 = vst.msk [vmem:[#allocation2 + $0x28] sm:$0xff] %vm1602_vm1, %v1591_v53  ;;  %v4091_v40 = vadd.f32 %v3640_v25, %v3472_v23  ;;  %v1537_v28 = vpop.f32.mrb[7].mxu0  ;;  %v1623_v9 = vld [vmem:[#allocation2] sm:$0xff] (!%p2958_p5)  ;;  %v1647_v6 = vsel (!%p2958_p5), %vm1602_vm1, %v1624_v1, 0  ;;  %v5199_v23 = vpack.c.bf16 (!%p2958_p5), %v1695_v44, %v1692_v32 }
 0x18e   : > { %1607 = vst.msk [vmem:[#allocation2 + $0x20] sm:$0xff] %vm1602_vm1, %v1590_v22  ;;  %v4092_v50 = vadd.f32 %v1537_v28, %v981_v60  ;;  %v3475_v51 = vpop.f32.mrb[8].mxu1  ;;  %v1644_v3 = vsel (!%p2958_p5), %vm1602_vm1, %v1623_v9, 0  ;;  %v5203_v25 = vand.u32 (!%p2958_p5), 4294901760, %v1647_v6  ;;  %v5211_v28 = vpack.c.bf16 (!%p2958_p5), %v1701_v36, %v1698_v21 }
 0x18f   : > { %v1593_v27 = vadd.f32 %v4091_v40, %v339_v56  ;;  %v993_v43 = vpop.f32.mrb[9].mxu1  ;;  %v5201_v56 = vand.u32 (!%p2958_p5), 4294901760, %v1644_v3  ;;  %v5205_v40 = vsub.f32 (!%p2958_p5), %v1639_v59, %v1692_v32  ;;  %4038 = vmatprep.subr.bf16.mxu1 (!%p2958_p5), %v5199_v23  ;;  %4062 = vmatprep.subr.bf16.mxu0 (!%p2958_p5), %v5199_v23 }
 0x190   : > { %v1592_v30 = vadd.f32 %v4092_v50, %v338_v11  ;;  %v3643_v35 = vpop.f32.mrb[8].mxu0  ;;  %v1626_v22 = vld [vmem:[#allocation2 + $0x18] sm:$0xff] (!%p2958_p5)  ;;  %v5213_v50 = vsub.f32 (!%p2958_p5), %v1640_v54, %v1695_v44  ;;  %4040 = vmatpush3.bf16.msra.mxu1 (!%p2958_p5), %v5199_v23  ;;  %4064 = vmatpush3.bf16.msra.mxu0 (!%p2958_p5), %v5199_v23 }
 0x191   : > { %1610 = vst.msk [vmem:[#allocation2 + $0x38] sm:$0xff] %vm1602_vm1, %v1593_v27  ;;  %v4093_v0 = vadd.f32 %v3643_v35, %v3475_v51  ;;  %v1547_v20 = vpop.f32.mrb[9].mxu0  ;;  %v1625_v53 = vld [vmem:[#allocation2 + $0x10] sm:$0xff] (!%p2958_p5)  ;;  %v5220_v51 = vsub.f32 (!%p2958_p5), %v1644_v3, %v5201_v56  ;;  %v1923_v35 = vand.u32 (!%p2958_p5), 4294901760, %v5205_v40  ;;  %4042 = vmatprep.subr.bf16.mxu1 (!%p2958_p5), %v5211_v28  ;;  %4066 = vmatprep.subr.bf16.mxu0 (!%p2958_p5), %v5211_v28 }
 0x192   : > { %1609 = vst.msk [vmem:[#allocation2 + $0x30] sm:$0xff] %vm1602_vm1, %v1592_v30  ;;  %v4094_v58 = vadd.f32 %v1547_v20, %v993_v43  ;;  %v3478_v31 = vpop.f32.mrb[10].mxu1  ;;  %v1650_v27 = vsel (!%p2958_p5), %vm1602_vm1, %v1625_v53, 0  ;;  %v1653_v30 = vsel (!%p2958_p5), %vm1602_vm1, %v1626_v22, 0  ;;  %v1930_v43 = vand.u32 (!%p2958_p5), 4294901760, %v5213_v50 }
 0x193   : > { %v1595_v24 = vadd.f32 %v4093_v0, %v341_v63  ;;  %v1005_v8 = vpop.f32.mrb[11].mxu1  ;;  %v5223_v63 = vsub.f32 (!%p2958_p5), %v1647_v6, %v5203_v25  ;;  %v5226_v0 = vand.u32 (!%p2958_p5), 4294901760, %v1650_v27  ;;  %v5284_v6 = vsub.f32 (!%p2958_p5), %v5188_v42, %v1698_v21 }
 0x194   : > { %v1594_v49 = vadd.f32 %v4094_v58, %v340_v19  ;;  %v3646_v55 = vpop.f32.mrb[10].mxu0  ;;  %v1628_v11 = vld [vmem:[#allocation2 + $0x28] sm:$0xff] (!%p2958_p5)  ;;  %v5231_v19 = vand.u32 (!%p2958_p5), 4294901760, %v1653_v30  ;;  %4044 = vmatpush3.bf16.msra.mxu1 (!%p2958_p5), %v5211_v28  ;;  %4068 = vmatpush3.bf16.msra.mxu0 (!%p2958_p5), %v5211_v28  ;;  %v5300_v21 = vsub.f32 (!%p2958_p5), %v5193_v61, %v1701_v36 }
 0x195   : > { %1612 = vst.msk [vmem:[#allocation2 + $0x48] sm:$0xff] %vm1602_vm1, %v1595_v24  ;;  %v4095_v7 = vadd.f32 %v3646_v55, %v3478_v31  ;;  %v1557_v48 = vpop.f32.mrb[11].mxu0  ;;  %v1627_v60 = vld [vmem:[#allocation2 + $0x20] sm:$0xff] (!%p2958_p5)  ;;  %v1659_v58 = vsel (!%p2958_p5), %vm1602_vm1, %v1628_v11, 0  ;;  %v1762_v24 = vand.u32 (!%p2958_p5), 4294901760, %v5220_v51  ;;  %v1924_v31 = vsub.f32 (!%p2958_p5), %v5205_v40, %v1923_v35 }
 0x196   : > { %1611 = vst.msk [vmem:[#allocation2 + $0x40] sm:$0xff] %vm1602_vm1, %v1594_v49  ;;  %v4096_v52 = vadd.f32 %v1557_v48, %v1005_v8  ;;  %v3481_v34 = vpop.f32.mrb[12].mxu1  ;;  %v1656_v20 = vsel (!%p2958_p5), %vm1602_vm1, %v1627_v60, 0  ;;  %v1772_v49 = vand.u32 (!%p2958_p5), 4294901760, %v5223_v63  ;;  %v1931_v55 = vsub.f32 (!%p2958_p5), %v5213_v50, %v1930_v43 }
 0x197   : > { %v1597_v16 = vadd.f32 %v4095_v7, %v343_v37  ;;  %v1017_v13 = vpop.f32.mrb[13].mxu1  ;;  %v5241_v37 = vsub.f32 (!%p2958_p5), %v1650_v27, %v5226_v0  ;;  %v4069_v7 = vpack.c.bf16 (!%p2958_p5), %v1930_v43, %v1923_v35  ;;  %v5245_v8 = vsub.f32 (!%p2958_p5), %v1653_v30, %v5231_v19  ;;  %3757 = vmatprep.mubr.f32.mxu0 (!%p2958_p5), %v1762_v24 }
 0x198   : > { %v1596_v12 = vadd.f32 %v4096_v52, %v342_v17  ;;  %v3649_v57 = vpop.f32.mrb[12].mxu0  ;;  %v5247_v17 = vand.u32 (!%p2958_p5), 4294901760, %v1656_v20  ;;  %v1763_v52 = vsub.f32 (!%p2958_p5), %v5220_v51, %v1762_v24  ;;  %3758 = vmatmul.mubr.f32.vlgmr.msra.gmra.mrb[0].mxu0 (!%p2958_p5), %v1772_v49  ;;  %v1937_v42 = vand.u32 (!%p2958_p5), 4294901760, %v5284_v6 }
 0x199   : > { %1614 = vst.msk [vmem:[#allocation2 + $0x58] sm:$0xff] %vm1602_vm1, %v1597_v16  ;;  %v4097_v62 = vadd.f32 %v3649_v57, %v3481_v34  ;;  %v1567_v29 = vpop.f32.mrb[13].mxu0  ;;  %v1629_v48 = vld [vmem:[#allocation2 + $0x30] sm:$0xff] (!%p2958_p5)  ;;  %v1773_v16 = vsub.f32 (!%p2958_p5), %v5223_v63, %v1772_v49  ;;  %v1782_v34 = vand.u32 (!%p2958_p5), 4294901760, %v5241_v37  ;;  %v1792_v57 = vand.u32 (!%p2958_p5), 4294901760, %v5245_v8  ;;  %4070 = vmatprep.subr.bf16.mxu0 (!%p2958_p5), %v4069_v7 }
 0x19a   : > { %1613 = vst.msk [vmem:[#allocation2 + $0x50] sm:$0xff] %vm1602_vm1, %v1596_v12  ;;  %v4098_v5 = vadd.f32 %v1567_v29, %v1017_v13  ;;  %v3484_v39 = vpop.f32.mrb[14].mxu1  ;;  %v1925_v12 = vand.u32 (!%p2958_p5), 4294901760, %v1924_v31  ;;  %v5258_v13 = vand.u32 (!%p2958_p5), 4294901760, %v1659_v58  ;;  %4072 = vmatpush3.bf16.msra.mxu0 (!%p2958_p5), %v4069_v7  ;;  %v1938_v7 = vsub.f32 (!%p2958_p5), %v5284_v6, %v1937_v42 }
 0x19b   : > { %v1599_v38 = vadd.f32 %v4097_v62, %v345_v41  ;;  %v1029_v46 = vpop.f32.mrb[15].mxu1  ;;  %v1932_v41 = vand.u32 (!%p2958_p5), 4294901760, %v1931_v55  ;;  %v5256_v62 = vsub.f32 (!%p2958_p5), %v1656_v20, %v5247_v17  ;;  %3760 = vmatprep.mubr.f32.mxu0 (!%p2958_p5), %v1782_v34  ;;  %v1944_v61 = vand.u32 (!%p2958_p5), 4294901760, %v5300_v21 }
 0x19c   : > { %v1598_v10 = vadd.f32 %v4098_v5, %v344_v15  ;;  %v3652_v14 = vpop.f32.mrb[14].mxu0  ;;  %1622 = sbr.rel (%p2958_p5) target bundleno = 724 (0x2d4), region = 81  ;;  %v1630_v15 = vld [vmem:[#allocation2 + $0x38] sm:$0xff] (!%p2958_p5)  ;;  %v1764_v5 = vand.u32 (!%p2958_p5), 4294901760, %v1763_v52  ;;  %3761 = vmatmul.mubr.f32.gmra.mrb[2].mxu0 (!%p2958_p5), %v1792_v57 }
 0x19d   : > { %1616 = vst.msk [vmem:[#allocation2 + $0x68] sm:$0xff] %vm1602_vm1, %v1599_v38  ;;  %v4099_v47 = vadd.f32 %v3652_v14, %v3484_v39  ;;  %v1577_v45 = vpop.f32.mrb[15].mxu0  ;;  %v1631_v29 = vld [vmem:[#allocation2 + $0x40] sm:$0xff] (!%p2958_p5)  ;;  %v1774_v38 = vand.u32 (!%p2958_p5), 4294901760, %v1773_v16  ;;  %v1662_v39 = vsel (!%p2958_p5), %vm1602_vm1, %v1629_v48, 0  ;;  %v1793_v14 = vsub.f32 (!%p2958_p5), %v5245_v8, %v1792_v57 }
 0x19e   : > { %1615 = vst.msk [vmem:[#allocation2 + $0x60] sm:$0xff] %vm1602_vm1, %v1598_v10  ;;  %v4100_v33 = vadd.f32 %v1577_v45, %v1029_v46  ;;  %v1783_v10 = vsub.f32 (!%p2958_p5), %v5241_v37, %v1782_v34  ;;  %v5265_v46 = vsub.f32 (!%p2958_p5), %v1659_v58, %v5258_v13  ;;  %3661 = vmatprep.mubr.f32.mxu1 (!%p2958_p5), %v1764_v5  ;;  %v1939_v57 = vand.u32 (!%p2958_p5), 4294901760, %v1938_v7 }
 0x19f   : > { %v1601_v18 = vadd.f32 %v4099_v47, %v347_v4  ;;  %v4045_v4 = vpack.c.bf16 (!%p2958_p5), %v1932_v41, %v1925_v12  ;;  %v1802_v47 = vand.u32 (!%p2958_p5), 4294901760, %v5256_v62  ;;  %3662 = vmatmul.mubr.f32.vlgmr.msra.gmra.mrb[0].mxu1 (!%p2958_p5), %v1774_v38  ;;  %v1794_v59 = vand.u32 (!%p2958_p5), 4294901760, %v1793_v14 }
 0x1a0   : > { %v1600_v26 = vadd.f32 %v4100_v33, %v346_v2  ;;  %v1632_v2 = vld [vmem:[#allocation2 + $0x48] sm:$0xff] (!%p2958_p5)  ;;  %v1784_v45 = vand.u32 (!%p2958_p5), 4294901760, %v1783_v10  ;;  %v5267_v33 = vand.u32 (!%p2958_p5), 4294901760, %v1662_v39  ;;  %v1812_v32 = vand.u32 (!%p2958_p5), 4294901760, %v5265_v46  ;;  %v1634_v43 = vld [vmem:[#allocation2 + $0x58] sm:$0xff] (!%p2958_p5) }
 0x1a1   : > { %1618 = vst.msk [vmem:[#allocation2 + $0x78] sm:$0xff] %vm1602_vm1, %v1601_v18  ;;  %v1665_v18 = vsel (!%p2958_p5), %vm1602_vm1, %v1630_v15, 0  ;;  %4046 = vmatprep.subr.bf16.mxu1 (!%p2958_p5), %v4045_v4  ;;  %v1803_v54 = vsub.f32 (!%p2958_p5), %v5256_v62, %v1802_v47  ;;  %v1671_v3 = vsel (!%p2958_p5), %vm1602_vm1, %v1632_v2, 0  ;;  %v1633_v53 = vld [vmem:[#allocation2 + $0x50] sm:$0xff] (!%p2958_p5)  ;;  %3763 = vmatprep.mubr.f32.mxu0 (!%p2958_p5), %v1802_v47  ;;  %v1677_v16 = vsel (!%p2958_p5), %vm1602_vm1, %v1634_v43, 0 }
 0x1a2   : > { %1617 = vst.msk [vmem:[#allocation2 + $0x70] sm:$0xff] %vm1602_vm1, %v1600_v26  ;;  %v1668_v26 = vsel (!%p2958_p5), %vm1602_vm1, %v1631_v29, 0  ;;  %v5273_v44 = vand.u32 (!%p2958_p5), 4294901760, %v1665_v18  ;;  %4048 = vmatpush3.bf16.msra.mxu1 (!%p2958_p5), %v4045_v4  ;;  %v5276_v9 = vsub.f32 (!%p2958_p5), %v1662_v39, %v5267_v33  ;;  %3664 = vmatprep.mubr.f32.mxu1 (!%p2958_p5), %v1784_v45  ;;  %v1813_v60 = vsub.f32 (!%p2958_p5), %v5265_v46, %v1812_v32 }
 0x1a3   : > { %v5278_v1 = vand.u32 4294901760, %v1668_v26  ;;  %v1804_v22 = vand.u32 4294901760, %v1803_v54  ;;  %v5290_v27 = vand.u32 4294901760, %v1671_v3  ;;  %3665 = vmatmul.mubr.f32.gmra.mrb[2].mxu1 %v1794_v59  ;;  %v1674_v49 = vsel %vm1602_vm1, %v1633_v53, 0  ;;  %3764 = vmatmul.mubr.f32.gmra.mrb[4].mxu0 %v1812_v32 }
 0x1a4   : > { %v5288_v11 = vsub.f32 %v1665_v18, %v5273_v44  ;;  %v1822_v30 = vand.u32 4294901760, %v5276_v9  ;;  %v1814_v20 = vand.u32 4294901760, %v1813_v60  ;;  %v5313_v52 = vand.u32 4294901760, %v1674_v49  ;;  %v1636_v29 = vld [vmem:[#allocation2 + $0x68] sm:$0xff] }
 0x1a5   : > { %v5294_v35 = vsub.f32 %v1668_v26, %v5278_v1  ;;  %v5304_v24 = vsub.f32 %v1671_v3, %v5290_v27  ;;  %3667 = vmatprep.mubr.f32.mxu1 %v1804_v22  ;;  %v1635_v12 = vld [vmem:[#allocation2 + $0x60] sm:$0xff]  ;;  %v1945_v15 = vsub.f32 %v5300_v21, %v1944_v61  ;;  %v4073_v10 = vpack.c.bf16 %v1944_v61, %v1937_v42 }
 0x1a6   : > { %v1832_v58 = vand.u32 4294901760, %v5288_v11  ;;  %v1823_v31 = vsub.f32 %v5276_v9, %v1822_v30  ;;  %3766 = vmatprep.mubr.f32.mxu0 %v1822_v30  ;;  %v5320_v39 = vsub.f32 %v1674_v49, %v5313_v52  ;;  %v5322_v2 = vand.u32 4294901760, %v1677_v16 }
 0x1a7   : > { %v1842_v55 = vand.u32 4294901760, %v5294_v35  ;;  %v1852_v48 = vand.u32 4294901760, %v5304_v24  ;;  %3668 = vmatmul.mubr.f32.gmra.mrb[4].mxu1 %v1814_v20  ;;  %v1946_v47 = vand.u32 4294901760, %v1945_v15  ;;  %v1680_v45 = vsel %vm1602_vm1, %v1635_v12, 0  ;;  %4074 = vmatprep.subr.bf16.mxu0 %v4073_v10 }
 0x1a8   : > { %v1833_v36 = vsub.f32 %v5288_v11, %v1832_v58  ;;  %v1824_v34 = vand.u32 4294901760, %v1823_v31  ;;  %v1638_v18 = vld [vmem:[#allocation2 + $0x78] sm:$0xff]  ;;  %v1862_v59 = vand.u32 4294901760, %v5320_v39  ;;  %v5326_v54 = vand.u32 4294901760, %v1680_v45  ;;  %3767 = vmatmul.mubr.f32.gmra.mrb[6].mxu0 %v1832_v58 }
 0x1a9   : > { %v1843_v41 = vsub.f32 %v5294_v35, %v1842_v55  ;;  %v1853_v38 = vsub.f32 %v5304_v24, %v1852_v48  ;;  %v1637_v4 = vld [vmem:[#allocation2 + $0x70] sm:$0xff]  ;;  %v1683_v32 = vsel %vm1602_vm1, %v1636_v29, 0  ;;  %v4049_v3 = vpack.c.bf16 %v1946_v47, %v1939_v57  ;;  %3769 = vmatprep.mubr.f32.mxu0 %v1842_v55  ;;  %4076 = vmatpush3.bf16.msra.mxu0 %v4073_v10 }
 0x1aa   : > { %v1834_v5 = vand.u32 4294901760, %v1833_v36  ;;  %3670 = vmatprep.mubr.f32.mxu1 %v1824_v34  ;;  %v5330_v53 = vsub.f32 %v1677_v16, %v5322_v2  ;;  %v5332_v22 = vand.u32 4294901760, %v1683_v32  ;;  %v1686_v60 = vsel %vm1602_vm1, %v1637_v4, 0  ;;  %4078 = vmatprep.subr.bf16.mxu0 %v5199_v23 }
 0x1ab   : > { %v1844_v14 = vand.u32 4294901760, %v1843_v41  ;;  %v1854_v26 = vand.u32 4294901760, %v1853_v38  ;;  %v1863_v30 = vsub.f32 %v5320_v39, %v1862_v59  ;;  %v5337_v42 = vsub.f32 %v1680_v45, %v5326_v54  ;;  %4050 = vmatprep.subr.bf16.mxu1 %v4049_v3 }
 0x1ac   : > { %3671 = vmatmul.mubr.f32.gmra.mrb[6].mxu1 %v1834_v5  ;;  %v5339_v43 = vand.u32 4294901760, %v1686_v60  ;;  %v1689_v20 = vsel %vm1602_vm1, %v1638_v18, 0  ;;  %v1872_v58 = vand.u32 4294901760, %v5330_v53  ;;  %v5344_v49 = vsub.f32 %v1683_v32, %v5332_v22  ;;  %3770 = vmatmul.mubr.f32.gmra.mrb[8].mxu0 %v1852_v48 }
 0x1ad   : > { %3673 = vmatprep.mubr.f32.mxu1 %v1844_v14  ;;  %v5346_v31 = vand.u32 4294901760, %v1689_v20  ;;  %v4053_v55 = vpack.c.bf16 %v5213_v50, %v5205_v40  ;;  %4052 = vmatpush3.bf16.msra.mxu1 %v4049_v3  ;;  %v1864_v7 = vand.u32 4294901760, %v1863_v30  ;;  %v1882_v61 = vand.u32 4294901760, %v5337_v42 }
 0x1ae   : > { %v5352_v36 = vsub.f32 %v1686_v60, %v5339_v43  ;;  %v1873_v16 = vsub.f32 %v5330_v53, %v1872_v58  ;;  %v1892_v12 = vand.u32 4294901760, %v5344_v49  ;;  %3772 = vmatprep.mubr.f32.mxu0 %v1862_v59  ;;  %v4057_v14 = vpack.c.bf16 %v5300_v21, %v5284_v6 }
 0x1af   : > { %v5357_v34 = vsub.f32 %v1689_v20, %v5346_v31  ;;  %4054 = vmatprep.subr.bf16.mxu1 %v4053_v55  ;;  %v1883_v40 = vsub.f32 %v5337_v42, %v1882_v61 }
 0x1b0   : > { %3674 = vmatmul.mubr.f32.gmra.mrb[8].mxu1 %v1854_v26  ;;  %v1902_v50 = vand.u32 4294901760, %v5352_v36  ;;  %v1874_v41 = vand.u32 4294901760, %v1873_v16  ;;  %v1893_v57 = vsub.f32 %v5344_v49, %v1892_v12  ;;  %3773 = vmatmul.mubr.f32.gmra.mrb[10].mxu0 %v1872_v58 }
 0x1b1   : > { %3676 = vmatprep.mubr.f32.mxu1 %v1864_v7  ;;  %v1912_v48 = vand.u32 4294901760, %v5357_v34  ;;  %v1884_v15 = vand.u32 4294901760, %v1883_v40  ;;  %3775 = vmatprep.mubr.f32.mxu0 %v1882_v61 }
 0x1b2   : > { %v1903_v29 = vsub.f32 %v5352_v36, %v1902_v50  ;;  %v1894_v5 = vand.u32 4294901760, %v1893_v57 }
 0x1b3   : > { %v1913_v38 = vsub.f32 %v5357_v34, %v1912_v48 }
 0x1b4   : > { %3677 = vmatmul.mubr.f32.gmra.mrb[10].mxu1 %v1874_v41  ;;  %v1904_v10 = vand.u32 4294901760, %v1903_v29  ;;  %3776 = vmatmul.mubr.f32.gmra.mrb[12].mxu0 %v1892_v12 }
 0x1b5   : > { %3679 = vmatprep.mubr.f32.mxu1 %v1884_v15  ;;  %3778 = vmatprep.mubr.f32.mxu0 %v1902_v50  ;;  %v1914_v4 = vand.u32 4294901760, %v1913_v38 }
 0x1b8   : > { %3680 = vmatmul.mubr.f32.gmra.mrb[12].mxu1 %v1894_v5  ;;  %3779 = vmatmul.mubr.f32.gmra.mrb[14].mxu0 %v1912_v48 }
 0x1b9   : > { %3682 = vmatprep.mubr.f32.mxu1 %v1904_v10  ;;  %3789 = vmatprep.mubr.f32.mxu0 %v5201_v56 }
 0x1bc   : > { %3683 = vmatmul.mubr.f32.gmra.mrb[14].mxu1 %v1914_v4  ;;  %3790 = vmatmul.mubr.f32.vlgmr.msra.gmra.mrb[0].mxu0 %v5203_v25 }
 0x1bd   : > { %3693 = vmatprep.mubr.f32.mxu1 %v5201_v56  ;;  %4080 = vmatpush3.bf16.msra.mxu0 %v5199_v23 }
 0x1be   : > { %3792 = vmatprep.mubr.f32.mxu0 %v5226_v0  ;;  %4082 = vmatprep.subr.bf16.mxu0 %v5211_v28 }
 0x1c0   : > { %3694 = vmatmul.mubr.f32.vlgmr.msra.gmra.mrb[0].mxu1 %v5203_v25  ;;  %3793 = vmatmul.mubr.f32.gmra.mrb[2].mxu0 %v5231_v19 }
 0x1c1   : > { %4056 = vmatpush3.bf16.msra.mxu1 %v4053_v55  ;;  %3696 = vmatprep.mubr.f32.mxu1 %v5226_v0 }
 0x1c2   : > { %4058 = vmatprep.subr.bf16.mxu1 %v4057_v14  ;;  %3795 = vmatprep.mubr.f32.mxu0 %v5247_v17 }
 0x1c3   : > { %4084 = vmatpush3.bf16.msra.mxu0 %v5211_v28 }
 0x1c4   : > { %3697 = vmatmul.mubr.f32.gmra.mrb[2].mxu1 %v5231_v19  ;;  %3796 = vmatmul.mubr.f32.gmra.mrb[4].mxu0 %v5258_v13 }
 0x1c5   : > { %3699 = vmatprep.mubr.f32.mxu1 %v5247_v17  ;;  %4060 = vmatpush3.bf16.msra.mxu1 %v4057_v14 }
 0x1c6   : > { %3798 = vmatprep.mubr.f32.mxu0 %v5267_v33 }
 0x1c8   : > { %3700 = vmatmul.mubr.f32.gmra.mrb[4].mxu1 %v5258_v13  ;;  %3799 = vmatmul.mubr.f32.gmra.mrb[6].mxu0 %v5273_v44 }
 0x1c9   : > { %3702 = vmatprep.mubr.f32.mxu1 %v5267_v33  ;;  %3801 = vmatprep.mubr.f32.mxu0 %v5278_v1 }
 0x1cc   : > { %3703 = vmatmul.mubr.f32.gmra.mrb[6].mxu1 %v5273_v44  ;;  %3802 = vmatmul.mubr.f32.gmra.mrb[8].mxu0 %v5290_v27 }
 0x1cd   : > { %3705 = vmatprep.mubr.f32.mxu1 %v5278_v1  ;;  %3804 = vmatprep.mubr.f32.mxu0 %v5313_v52 }
 0x1d0   : > { %3706 = vmatmul.mubr.f32.gmra.mrb[8].mxu1 %v5290_v27  ;;  %3805 = vmatmul.mubr.f32.gmra.mrb[10].mxu0 %v5322_v2 }
 0x1d1   : > { %3708 = vmatprep.mubr.f32.mxu1 %v5313_v52  ;;  %3807 = vmatprep.mubr.f32.mxu0 %v5326_v54 }
 0x1d4   : > { %3709 = vmatmul.mubr.f32.gmra.mrb[10].mxu1 %v5322_v2  ;;  %3808 = vmatmul.mubr.f32.gmra.mrb[12].mxu0 %v5332_v22 }
 0x1d5   : > { %3711 = vmatprep.mubr.f32.mxu1 %v5326_v54  ;;  %3810 = vmatprep.mubr.f32.mxu0 %v5339_v43 }
 0x1d8   : > { %3712 = vmatmul.mubr.f32.gmra.mrb[12].mxu1 %v5332_v22  ;;  %3811 = vmatmul.mubr.f32.gmra.mrb[14].mxu0 %v5346_v31 }
 0x1d9   : > { %3714 = vmatprep.mubr.f32.mxu1 %v5339_v43  ;;  %3821 = vmatprep.mubr.f32.mxu0 %v5201_v56 }
 0x1dc   : > { %3715 = vmatmul.mubr.f32.gmra.mrb[14].mxu1 %v5346_v31  ;;  %3822 = vmatmul.mubr.f32.vlgmr.msra.gmra.mrb[0].mxu0 %v5203_v25 }
 0x1dd   : > { %3725 = vmatprep.mubr.f32.mxu1 %v5220_v51  ;;  %3824 = vmatprep.mubr.f32.mxu0 %v5226_v0 }
 0x1e0   : > { %3726 = vmatmul.mubr.f32.vlgmr.msra.gmra.mrb[0].mxu1 %v5223_v63  ;;  %3825 = vmatmul.mubr.f32.gmra.mrb[2].mxu0 %v5231_v19 }
 0x1e1   : > { %3728 = vmatprep.mubr.f32.mxu1 %v5241_v37  ;;  %3827 = vmatprep.mubr.f32.mxu0 %v5247_v17 }
 0x1e4   : > { %3729 = vmatmul.mubr.f32.gmra.mrb[2].mxu1 %v5245_v8  ;;  %3828 = vmatmul.mubr.f32.gmra.mrb[4].mxu0 %v5258_v13 }
 0x1e5   : > { %3731 = vmatprep.mubr.f32.mxu1 %v5256_v62  ;;  %3830 = vmatprep.mubr.f32.mxu0 %v5267_v33 }
 0x1e8   : > { %3732 = vmatmul.mubr.f32.gmra.mrb[4].mxu1 %v5265_v46  ;;  %3831 = vmatmul.mubr.f32.gmra.mrb[6].mxu0 %v5273_v44 }
 0x1e9   : > { %3734 = vmatprep.mubr.f32.mxu1 %v5276_v9  ;;  %3833 = vmatprep.mubr.f32.mxu0 %v5278_v1 }
 0x1ec   : > { %3735 = vmatmul.mubr.f32.gmra.mrb[6].mxu1 %v5288_v11  ;;  %3834 = vmatmul.mubr.f32.gmra.mrb[8].mxu0 %v5290_v27 }
 0x1ed   : > { %3737 = vmatprep.mubr.f32.mxu1 %v5294_v35  ;;  %3836 = vmatprep.mubr.f32.mxu0 %v5313_v52 }
 0x1f0   : > { %3738 = vmatmul.mubr.f32.gmra.mrb[8].mxu1 %v5304_v24  ;;  %3837 = vmatmul.mubr.f32.gmra.mrb[10].mxu0 %v5322_v2 }
 0x1f1   : > { %3740 = vmatprep.mubr.f32.mxu1 %v5320_v39  ;;  %3839 = vmatprep.mubr.f32.mxu0 %v5326_v54 }
 0x1f4   : > { %3741 = vmatmul.mubr.f32.gmra.mrb[10].mxu1 %v5330_v53  ;;  %3840 = vmatmul.mubr.f32.gmra.mrb[12].mxu0 %v5332_v22 }
 0x1f5   : > { %3743 = vmatprep.mubr.f32.mxu1 %v5337_v42  ;;  %3842 = vmatprep.mubr.f32.mxu0 %v5339_v43 }
 0x1f8   : > { %3744 = vmatmul.mubr.f32.gmra.mrb[12].mxu1 %v5344_v49  ;;  %3843 = vmatmul.mubr.f32.gmra.mrb[14].mxu0 %v5346_v31 }
 0x1f9   : > { %3746 = vmatprep.mubr.f32.mxu1 %v5352_v36 }
 0x1fc   : > { %3747 = vmatmul.mubr.f32.gmra.mrb[14].mxu1 %v5357_v34 }
 0x2af   : > { %v3823_v23 = vpop.f32.mrb[0].mxu0 }
 0x2b0   : > { %v2727_v25 = vpop.f32.mrb[1].mxu0 }
 0x2b3   : > { %v3727_v56 = vpop.f32.mrb[0].mxu1  ;;  %v3826_v0 = vpop.f32.mrb[2].mxu0 }
 0x2b4   : > { %v4165_v28 = vadd.f32 %v3823_v23, %v3727_v56  ;;  %v2177_v51 = vpop.f32.mrb[1].mxu1  ;;  %v2739_v37 = vpop.f32.mrb[3].mxu0 }
 0x2b5   : > { %v4166_v63 = vadd.f32 %v2727_v25, %v2177_v51 }
 0x2b6   : > { %2822 = vst [vmem:[%s4602_s26 + $0x8] sm:$0xff] %v4165_v28 }
 0x2b7   : > { %2821 = vst [vmem:[%s4602_s26] sm:$0xff] %v4166_v63  ;;  %v3730_v19 = vpop.f32.mrb[2].mxu1  ;;  %v3829_v13 = vpop.f32.mrb[4].mxu0 }
 0x2b8   : > { %v4167_v8 = vadd.f32 %v3826_v0, %v3730_v19  ;;  %v2191_v17 = vpop.f32.mrb[3].mxu1  ;;  %v2751_v33 = vpop.f32.mrb[5].mxu0 }
 0x2b9   : > { %v4168_v62 = vadd.f32 %v2739_v37, %v2191_v17 }
 0x2ba   : > { %2824 = vst [vmem:[%s4602_s26 + $0x18] sm:$0xff] %v4167_v8 }
 0x2bb   : > { %2823 = vst [vmem:[%s4602_s26 + $0x10] sm:$0xff] %v4168_v62  ;;  %v3733_v46 = vpop.f32.mrb[4].mxu1  ;;  %v3832_v6 = vpop.f32.mrb[6].mxu0 }
 0x2bc   : > { %v4169_v44 = vadd.f32 %v3829_v13, %v3733_v46  ;;  %v2205_v9 = vpop.f32.mrb[5].mxu1  ;;  %v2763_v27 = vpop.f32.mrb[7].mxu0 }
 0x2bd   : > { %v4170_v1 = vadd.f32 %v2751_v33, %v2205_v9 }
 0x2be   : > { %2826 = vst [vmem:[%s4602_s26 + $0x28] sm:$0xff] %v4169_v44 }
 0x2bf   : > { %2825 = vst [vmem:[%s4602_s26 + $0x20] sm:$0xff] %v4170_v1  ;;  %v3736_v11 = vpop.f32.mrb[6].mxu1  ;;  %v3835_v52 = vpop.f32.mrb[8].mxu0 }
 0x2c0   : > { %v4171_v35 = vadd.f32 %v3832_v6, %v3736_v11  ;;  %v2219_v21 = vpop.f32.mrb[7].mxu1  ;;  %v2775_v47 = vpop.f32.mrb[9].mxu0 }
 0x2c1   : > { %v4172_v24 = vadd.f32 %v2763_v27, %v2219_v21 }
 0x2c2   : > { %2828 = vst [vmem:[%s4602_s26 + $0x38] sm:$0xff] %v4171_v35 }
 0x2c3   : > { %2827 = vst [vmem:[%s4602_s26 + $0x30] sm:$0xff] %v4172_v24  ;;  %v3739_v39 = vpop.f32.mrb[8].mxu1  ;;  %v3838_v26 = vpop.f32.mrb[10].mxu0 }
 0x2c4   : > { %v4173_v2 = vadd.f32 %v3835_v52, %v3739_v39  ;;  %v2233_v45 = vpop.f32.mrb[9].mxu1  ;;  %v2787_v54 = vpop.f32.mrb[11].mxu0 }
 0x2c5   : > { %v4174_v18 = vadd.f32 %v2775_v47, %v2233_v45 }
 0x2c6   : > { %2830 = vst [vmem:[%s4602_s26 + $0x48] sm:$0xff] %v4173_v2 }
 0x2c7   : > { %2829 = vst [vmem:[%s4602_s26 + $0x40] sm:$0xff] %v4174_v18  ;;  %v3742_v59 = vpop.f32.mrb[10].mxu1  ;;  %v3841_v22 = vpop.f32.mrb[12].mxu0 }
 0x2c8   : > { %v4175_v32 = vadd.f32 %v3838_v26, %v3742_v59  ;;  %v2247_v3 = vpop.f32.mrb[11].mxu1  ;;  %v2799_v30 = vpop.f32.mrb[13].mxu0 }
 0x2c9   : > { %v4176_v53 = vadd.f32 %v2787_v54, %v2247_v3 }
 0x2ca   : > { %2832 = vst [vmem:[%s4602_s26 + $0x58] sm:$0xff] %v4175_v32 }
 0x2cb   : > { %2831 = vst [vmem:[%s4602_s26 + $0x50] sm:$0xff] %v4176_v53  ;;  %v3745_v60 = vpop.f32.mrb[12].mxu1  ;;  %v3844_v58 = vpop.f32.mrb[14].mxu0 }
 0x2cc   : > { %v4177_v42 = vadd.f32 %v3841_v22, %v3745_v60  ;;  %v2261_v43 = vpop.f32.mrb[13].mxu1  ;;  %v2811_v31 = vpop.f32.mrb[15].mxu0 }
 0x2cd   : > { %v4178_v20 = vadd.f32 %v2799_v30, %v2261_v43 }
 0x2ce   : > { %2834 = vst [vmem:[%s4602_s26 + $0x68] sm:$0xff] %v4177_v42 }
 0x2cf   : > { %2833 = vst [vmem:[%s4602_s26 + $0x60] sm:$0xff] %v4178_v20  ;;  %v3748_v49 = vpop.f32.mrb[14].mxu1 }
 0x2d0   : > { %v4179_v55 = vadd.f32 %v3844_v58, %v3748_v49  ;;  %v2275_v7 = vpop.f32.mrb[15].mxu1 }
 0x2d1   : > { %v4180_v61 = vadd.f32 %v2811_v31, %v2275_v7 }
 0x2d2   : > { %2836 = vst [vmem:[%s4602_s26 + $0x78] sm:$0xff] %v4179_v55 }
 0x2d3   : > { %2835 = vst [vmem:[%s4602_s26 + $0x70] sm:$0xff] %v4180_v61 }
 0x2d4 PF: > { %s2965_s17 = sshll.u32 %s4433_s18, 11  ;;  %s2851_s28 = sshll.u32 %s4602_s26, 4  ;;  %s5458_s28 = int_to_ptr.vmem [resolvable:$true] %s2851_s28 }
 0x2d5   : > { %s5455_s15 = scalar_lea.hbm %s5523_s3, %s2965_s17  ;;  %s5462_s9 = scalar_lea.sflag [#allocation5], %s300_s5 }
 0x2d6   : > { %s4335_s10 = scalar_lea.vmem %s5458_s28, 2048  ;;  %s4448_s18 = smov [#allocation4]  }
 0x2d7   : > { %p4336_p6 = scmp.ne.s32.totalorder %s5458_s28, %s4335_s10  ;;  %s4339_s11 = sshll.u32 %s4448_s18, 4  ;;  %s4340_s11 = int_to_ptr.vmem [resolvable:$false] %s4339_s11 }
 0x2d8   : > { %s4341_s22 = scalar_lea.vmem %s4340_s11, 4096  ;;  %p4342_p10 = scmp.lt.s32.totalorder %s5458_s28, %s4340_s11 }
 0x2d9   : > { %p4337_p8 = pnand %p4336_p6, %p4543_p7  ;;  %p4343_p11 = scmp.lt.s32.totalorder %s4341_s22, %s4335_s10 }
 0x2db   : > { %p4338_p9 = pneg %p4337_p8  ;;  %p4344_p13 = por %p4343_p11, %p4342_p10 }
 0x2dd   : > { %p4345_p0 = pnand %p4344_p13, %p4338_p9 }
 0x2df   : > { %4348 = shalt.err (!%p4345_p0)
}
 0x2e0   : > { %s4349_s5 = scalar_lea.hbm %s5455_s15, 2048  ;;  %s4353_s27 = scalar_lea.hbm %s5523_s3, 4096 }
 0x2e1   : > { %p4350_p1 = scmp.ne.s32.totalorder %s5455_s15, %s4349_s5  ;;  %p4354_p4 = scmp.lt.u32.totalorder %s5455_s15, %s5523_s3 }
 0x2e2   : > { %p4355_p5 = scmp.lt.u32.totalorder %s4353_s27, %s4349_s5  ;;  %p4357_p8 = scmp.lt.u32.totalorder %s4349_s5, %s5455_s15 }
 0x2e3   : > { %p4351_p2 = pnand %p4350_p1, %p4543_p7 }
 0x2e4   : > { %p4356_p6 = por %p4355_p5, %p4354_p4 }
 0x2e5   : > { %p4352_p3 = pneg %p4351_p2 }
 0x2e6   : > { %p4358_p9 = por %p4357_p8, %p4356_p6 }
 0x2e8   : > { %p4359_p10 = pnand %p4358_p9, %p4352_p3 }
 0x2ea   : > { %4362 = shalt.err (!%p4359_p10)
}
 0x2eb   : > { %s4449_s29 = smov 128   ;;  %s4450_s10 = smov 8  }
 0x2ec   : > { %4245 = dma.vmem_to_hbm [thread:$0]  (%p4543_p7), %s5458_s28, 2048, %s5455_s15, %s5462_s9, %s4449_s29, %s4449_s29, %s4450_s10  }
 0x2ed PF: > { %p4251_p11 = scmp.ge.s32.totalorder %s4445_s21, 2  ;;  %s2866_s18 = sand.u32 1, %s4409_s12  }
 0x2ee   : > { %s2867_s11 = scalar_lea.sflag [#allocation5], %s2866_s18 }
 0x2ef   : > { %p4248_p13 = pnand %p4251_p11, %p4551_p12 }
 0x2f1   : > { %4404 = dma.done.wait (!%p4248_p13), %s2867_s11, 2048  }
 0x2f2   : > { %4406 = vsyncadd (!%p4248_p13), %s2867_s11, 4294965248  ;;  %s16_s21 = sadd.s32 1, %s4445_s21   ;;  %s5643_s12 = smov %s4413_s13 }
 0x2f3   : > { %p13_p0 = scmp.ge.s32.totalorder %s16_s21, 6   ;;  %s5644_s13 = smov %s4417_s14 }
 0x2f4   : > { %s5645_s14 = smov %s4556_s7  ;;  %s5646_s15 = smov %s4425_s16 }
 0x2f5   : > { %s5647_s16 = smov %s4559_s8  ;;  %s5648_s17 = smov %s4437_s19 }
 0x2f6   : > { %s5649_s18 = smov %s4441_s20  ;;  %s5650_s19 = smov %s5653_s24 }
 0x2f7   : > { %s5651_s20 = smov %s5657_s25  ;;  %15 = sbr.rel (!%p13_p0) target bundleno = 6 (0x6), region = 124 }
 0x2fe   :  { %2872 = vsyncpa [#allocation5], 1 }
 0x2ff   :  { %2874 = vsyncpa [#allocation5 + $0x1], 1 }

</bundles_post_ra>
